<compile_context>
chip_gen: v7x
topology: tpu7x:2x2x1
jax: 0.10.0
libtpu: 0.0.40
codegen_flags: <defaults>
</compile_context>

<pallas_src>
from functools import partial

import jax
import jax.numpy as jnp
from jax.experimental import pallas as pl
from jax.experimental.pallas import tpu as pltpu

# Explicit VMEM budget (review): v7x has only 64 MiB physical per TensorCore
# (vs 128 MiB on v5e/v6e); every block used below stays far under this cap.
_VMEM_LIMIT_BYTES = 64 * 1024 * 1024


def _pick_tn(co):
    """Output-channel tile: lane-dense 128-multiple, or the full dim."""
    if co % 256 == 0:
        return 256
    if co % 128 == 0:
        return 128
    return co  # full-dim blocks are always legal


def _compiler_params():
    return pltpu.CompilerParams(
        dimension_semantics=("parallel", "parallel"),
        vmem_limit_bytes=_VMEM_LIMIT_BYTES)


# ----------------------------------------------------------------------------
# Kernel A: per-sample fused matmul (1x1 convs): out = relu?(x @ w + b (+ res))
# ----------------------------------------------------------------------------
def _matmul_kernel(x_ref, w_ref, b_ref, *rest, relu, has_res):
    if has_res:
        r_ref, o_ref = rest
    else:
        (o_ref,) = rest
        r_ref = None
    # bf16 x bf16 -> f32 on the MXU; bias folded into the accumulator init.
    acc = b_ref[...] + jnp.dot(x_ref[0], w_ref[...],
                               preferred_element_type=jnp.float32)
    if r_ref is not None:
        acc = acc + r_ref[0].astype(jnp.float32)
    if relu:
        acc = jnp.maximum(acc, 0.0)
    o_ref[0] = acc.astype(o_ref.dtype)


def fused_matmul(x, w, bias, residual=None, relu=True, out_dtype=jnp.bfloat16):
    """x: (N, M, K); w: (K, Co); bias: (Co,); residual: (N, M, Co) or None."""
    n, m, k = x.shape
    co = w.shape[1]
    tn = _pick_tn(co)

    in_specs = [
        pl.BlockSpec((1, m, k), lambda j, b: (b, 0, 0)),   # activations per sample
        pl.BlockSpec((k, tn), lambda j, b: (0, j)),        # weight: resident over b
        pl.BlockSpec((1, tn), lambda j, b: (0, j)),        # folded-BN bias
    ]
    inputs = [x.astype(jnp.bfloat16), w.astype(jnp.bfloat16),
              bias.astype(jnp.float32).reshape(1, co)]
    if residual is not None:
        in_specs.append(pl.BlockSpec((1, m, tn), lambda j, b: (b, 0, j)))
        inputs.append(residual.astype(jnp.bfloat16))

    return pl.pallas_call(
        partial(_matmul_kernel, relu=relu, has_res=residual is not None),
        out_shape=jax.ShapeDtypeStruct((n, m, co), out_dtype),
        grid=(co // tn, n),                  # sample axis innermost -> weight reuse
        in_specs=in_specs,
        out_specs=pl.BlockSpec((1, m, tn), lambda j, b: (b, 0, j)),
        compiler_params=_compiler_params(),
    )(*inputs)


# ----------------------------------------------------------------------------
# Kernel B: implicit-GEMM 3x3 conv (pad=1, stride s), fused BN bias + ReLU
# ----------------------------------------------------------------------------
def _conv3x3_kernel(x_ref, w_ref, b_ref, o_ref, *, taps, ho, wo, relu):
    c = x_ref.shape[-1]
    m = ho * wo
    xv = x_ref[...]                          # (P, Hp, Wp, C) phase images in VMEM
    acc = b_ref[...].astype(jnp.float32)     # (1, tn): bias-initialized accumulator
    for t, (p, oh, ow) in enumerate(taps):   # 9 unrolled taps, one f32 accumulator
        patch = xv[p, oh:oh + ho, ow:ow + wo, :].reshape(m, c)
        acc = acc + jnp.dot(patch, w_ref[t], preferred_element_type=jnp.float32)
    if relu:
        acc = jnp.maximum(acc, 0.0)
    o_ref[0] = acc.astype(o_ref.dtype)


def conv3x3(x, w_taps, bias, stride, relu=True, out_dtype=jnp.bfloat16):
    """3x3 conv, padding=1, stride s, fused folded-BN bias + ReLU.

    x: (N, H, W, C) NHWC; w_taps: (9, C, Co) tap-major (BN-folded); bias: (Co,)
    Returns (N, Ho*Wo, Co) and (Ho, Wo).
    """
    n, h, w, c = x.shape
    s = stride
    co = w_taps.shape[-1]
    ho = (h - 1) // s + 1
    wo = (w - 1) // s + 1
    e = 2 // s                              # per-phase halo (2 for s=1, 1 for s=2)
    hp, wp = (ho + e) * s, (wo + e) * s

    xb = x.astype(jnp.bfloat16)
    xp = jnp.pad(xb, ((0, 0), (1, hp - 1 - h), (1, wp - 1 - w), (0, 0)))
    if s == 1:
        pcount, hph, wph = 1, hp, wp
        phases = xp                                              # (N, Hp, Wp, C)
    else:
        # Space-to-depth phase split (stride-2 blocks only, ~1x extra traffic)
        # so that every tap reads a contiguous window inside the kernel.
        pcount, hph, wph = s * s, hp // s, wp // s
        phases = jnp.stack(
            [xp[:, a::s, b::s, :] for a in range(s) for b in range(s)],
            axis=1).reshape(n * pcount, hph, wph, c)
    taps = [((dh % s) * s + (dw % s), dh // s, dw // s)
            for dh in range(3) for dw in range(3)]

    tn = _pick_tn(co)
    mo = ho * wo
    out = pl.pallas_call(
        partial(_conv3x3_kernel, taps=taps, ho=ho, wo=wo, relu=relu),
        out_shape=jax.ShapeDtypeStruct((n, mo, co), out_dtype),
        grid=(co // tn, n),
        in_specs=[
            pl.BlockSpec((pcount, hph, wph, c), lambda j, b: (b, 0, 0, 0)),
            pl.BlockSpec((9, c, tn), lambda j, b: (0, 0, j)),    # resident over b
            pl.BlockSpec((1, tn), lambda j, b: (0, j)),
        ],
        out_specs=pl.BlockSpec((1, mo, tn), lambda j, b: (b, 0, j)),
        compiler_params=_compiler_params(),
    )(phases, w_taps.astype(jnp.bfloat16), bias.astype(jnp.float32).reshape(1, co))
    return out, (ho, wo)


# ----------------------------------------------------------------------------
# BN folding (inference-mode) and Bottleneck forward
# ----------------------------------------------------------------------------
def fold_bn(w, bn, eps=1e-5):
    """w: (..., Co). Returns (w * scale, bias) with BN folded per output channel."""
    g, b, m, v = bn
    scale = g / jnp.sqrt(v + eps)
    return w * scale, b - m * scale


def bottleneck_forward(x_nchw, p, stride, downsampling, expansion=4):
    x = jnp.transpose(x_nchw, (0, 2, 3, 1)).astype(jnp.bfloat16)  # NHWC, bf16
    n, h, w, cin = x.shape

    # conv1: 1x1 + BN + ReLU
    w1, b1 = fold_bn(p["w1"][:, :, 0, 0].T, p["bn1"])
    places = w1.shape[1]
    out1 = fused_matmul(x.reshape(n, h * w, cin), w1, b1, relu=True)
    out1 = out1.reshape(n, h, w, places)

    # conv2: 3x3 stride-s pad-1 + BN + ReLU  (implicit GEMM, no im2col tensor)
    w2 = jnp.transpose(p["w2"], (2, 3, 1, 0)).reshape(9, places, places)
    w2, b2 = fold_bn(w2, p["bn2"])
    out2, (ho, wo) = conv3x3(out1, w2, b2, stride, relu=True)

    # residual branch
    out_c = places * expansion
    if downsampling:
        xs = x[:, ::stride, ::stride, :]          # small decimation pass (see TODO)
        wd, bd = fold_bn(p["wd"][:, :, 0, 0].T, p["bnd"])
        res = fused_matmul(xs.reshape(n, ho * wo, cin), wd, bd, relu=False)
    else:
        assert stride == 1 and cin == out_c, (
            "identity residual requires stride == 1 and in_places == places*expansion")
        res = x.reshape(n, h * w, cin)            # bf16 identity residual

    # conv3: 1x1 + BN, fused residual add + ReLU; bf16 out, upcast after transpose
    w3, b3 = fold_bn(p["w3"][:, :, 0, 0].T, p["bn3"])
    out3 = fused_matmul(out2, w3, b3, residual=res, relu=True)

    out = out3.reshape(n, ho, wo, out_c)
    return jnp.transpose(out, (0, 3, 1, 2)).astype(jnp.float32)   # NHWC -> NCHW


# ----------------------------------------------------------------------------
# Pure-JAX f32 reference (mirrors the PyTorch forward, inference-mode BN)
# ----------------------------------------------------------------------------
def bottleneck_reference(x, p, stride, downsampling, eps=1e-5):
    def conv(y, w, s, pad):
        return jax.lax.conv_general_dilated(
            y, w, window_strides=(s, s), padding=[(pad, pad), (pad, pad)],
            dimension_numbers=("NCHW", "OIHW", "NCHW"))

    def bn(y, stats):
        g, b, m, v = stats
        inv = g / jnp.sqrt(v + eps)
        return y * inv[None, :, None, None] + (b - m * inv)[None, :, None, None]

    out = jax.nn.relu(bn(conv(x, p["w1"], 1, 0), p["bn1"]))
    out = jax.nn.relu(bn(conv(out, p["w2"], stride, 1), p["bn2"]))
    out = bn(conv(out, p["w3"], 1, 0), p["bn3"])
    res = bn(conv(x, p["wd"], stride, 0), p["bnd"]) if downsampling else x
    return jax.nn.relu(out + res)


# ----------------------------------------------------------------------------
# Deterministic parameter init (shapes per Bottleneck.__init__)
# ----------------------------------------------------------------------------
def init_params(key, in_places, places, expansion):
    ks = jax.random.split(key, 8)

    def bn_params(k, c):
        k1, k2, k3, k4 = jax.random.split(k, 4)
        return (
            jax.random.uniform(k1, (c,), minval=0.5, maxval=1.5),   # gamma
            jax.random.normal(k2, (c,)) * 0.1,                      # beta
            jax.random.normal(k3, (c,)) * 0.1,                      # running_mean
            jax.random.uniform(k4, (c,), minval=0.5, maxval=1.5),   # running_var
        )

    out_c = places * expansion
    return {
        "w1": jax.random.normal(ks[0], (places, in_places, 1, 1)) * 0.1,
        "bn1": bn_params(ks[1], places),
        "w2": jax.random.normal(ks[2], (places, places, 3, 3)) * 0.1,
        "bn2": bn_params(ks[3], places),
        "w3": jax.random.normal(ks[4], (out_c, places, 1, 1)) * 0.1,
        "bn3": bn_params(ks[5], out_c),
        "wd": jax.random.normal(ks[6], (out_c, in_places, 1, 1)) * 0.1,
        "bnd": bn_params(ks[7], out_c),
    }


def _run_case(name, x, params, stride, downsampling, expansion):
    fwd = jax.jit(lambda xx, pp: bottleneck_forward(xx, pp, stride,
                                                    downsampling, expansion))
    out = jax.block_until_ready(fwd(x, params))
    ref = bottleneck_reference(x, params, stride, downsampling)
    assert out.shape == ref.shape, f"{name}: shape {out.shape} vs {ref.shape}"
    # bf16 operands / f32 accumulation -> bf16-appropriate tolerance.
    assert jnp.allclose(out, ref, atol=5e-2, rtol=5e-2), f"{name}: mismatch vs ref"


if __name__ == "__main__":
    key = jax.random.PRNGKey(0)

    # Case 1: stride-2 downsampling block (exercises all four convs + phase split).
    k1, k2, key = jax.random.split(key, 3)
    in_places, places, expansion = 32, 16, 4
    x1 = jax.random.normal(k1, (2, in_places, 16, 16), dtype=jnp.float32)
    p1 = init_params(k2, in_places, places, expansion)
    _run_case("downsample", x1, p1, stride=2, downsampling=True, expansion=expansion)

    # Case 2: identity-residual block (stride 1, in_places == places * expansion).
    k3, k4, key = jax.random.split(key, 3)
    in_places, places, expansion = 64, 16, 4
    x2 = jax.random.normal(k3, (2, in_places, 8, 8), dtype=jnp.float32)
    p2 = init_params(k4, in_places, places, expansion)
    _run_case("identity", x2, p2, stride=1, downsampling=False, expansion=expansion)

    print("KERNEL_OK")
</pallas_src>

<mosaic_0001>
module attributes {stable_mosaic.version = 11 : i64} {
  func.func @_matmul_kernel(%arg0: i32, %arg1: i32, %arg2: memref<1x256x32xbf16, #tpu.memory_space<vmem>>, %arg3: memref<32x16xbf16, #tpu.memory_space<vmem>>, %arg4: memref<1x16xf32, #tpu.memory_space<vmem>>, %arg5: memref<1x256x16xbf16, #tpu.memory_space<vmem>>) attributes {dimension_semantics = [#tpu.dimension_semantics<parallel>, #tpu.dimension_semantics<parallel>], iteration_bounds = array<i64: 1, 2>, scalar_prefetch = 0 : i64, scratch_operands = 0 : i64, tpu.core_type = #tpu.core_type<tc>, window_params = [{transform_indices = @transform_0, window_bounds = array<i64: 1, 256, 32>}, {transform_indices = @transform_1, window_bounds = array<i64: 32, 16>}, {transform_indices = @transform_2, window_bounds = array<i64: 1, 16>}, {transform_indices = @transform_3, window_bounds = array<i64: 1, 256, 16>}]} {
    %c0 = arith.constant 0 : index
    %c0_0 = arith.constant 0 : index
    %0 = vector.load %arg4[%c0, %c0_0] : memref<1x16xf32, #tpu.memory_space<vmem>>, vector<1x16xf32>
    %c0_1 = arith.constant 0 : index
    %c0_2 = arith.constant 0 : index
    %c0_3 = arith.constant 0 : index
    %1 = vector.load %arg2[%c0_1, %c0_2, %c0_3] : memref<1x256x32xbf16, #tpu.memory_space<vmem>>, vector<1x256x32xbf16>
    %2 = vector.shape_cast %1 : vector<1x256x32xbf16> to vector<256x32xbf16>
    %c0_4 = arith.constant 0 : index
    %c0_5 = arith.constant 0 : index
    %3 = vector.load %arg3[%c0_4, %c0_5] : memref<32x16xbf16, #tpu.memory_space<vmem>>, vector<32x16xbf16>
    %cst = arith.constant dense<0.000000e+00> : vector<256x16xf32>
    %4 = tpu.matmul %2, %3, %cst {dimension_numbers = #tpu.dot_dimension_numbers<[1], [0], [0], [1], [0, 0, 1, 1], [], []>} : vector<256x32xbf16>, vector<32x16xbf16>, vector<256x16xf32> -> vector<256x16xf32>
    %5 = vector.broadcast %0 : vector<1x16xf32> to vector<256x16xf32>
    %6 = arith.addf %5, %4 : vector<256x16xf32>
    %cst_6 = arith.constant 0.000000e+00 : f32
    %7 = vector.broadcast %cst_6 : f32 to vector<256x16xf32>
    %8 = arith.maximumf %6, %7 : vector<256x16xf32>
    %9 = arith.truncf %8 : vector<256x16xf32> to vector<256x16xbf16>
    %c0_7 = arith.constant 0 : index
    %c0_8 = arith.constant 0 : index
    %c0_9 = arith.constant 0 : index
    %10 = vector.load %arg5[%c0_7, %c0_8, %c0_9] : memref<1x256x16xbf16, #tpu.memory_space<vmem>>, vector<1x256x16xbf16>
    %11 = vector.shape_cast %10 : vector<1x256x16xbf16> to vector<256x16xbf16>
    %12 = vector.shape_cast %9 : vector<256x16xbf16> to vector<1x256x16xbf16>
    tpu.vector_store %arg5[%c0_7, %c0_8, %c0_9], %12 {strides = array<i32>} : memref<1x256x16xbf16, #tpu.memory_space<vmem>>, vector<1x256x16xbf16>,
    return
  }
  func.func @transform_0(%arg0: i32, %arg1: i32) -> (i32, i32, i32) {
    %c0_i32 = arith.constant 0 : i32
    %c0_i32_0 = arith.constant 0 : i32
    %c0_i32_1 = arith.constant 0 : i32
    return %arg1, %c0_i32, %c0_i32_0 : i32, i32, i32
  }
  func.func @transform_1(%arg0: i32, %arg1: i32) -> (i32, i32) {
    %c0_i32 = arith.constant 0 : i32
    %c0_i32_0 = arith.constant 0 : i32
    return %c0_i32, %arg0 : i32, i32
  }
  func.func @transform_2(%arg0: i32, %arg1: i32) -> (i32, i32) {
    %c0_i32 = arith.constant 0 : i32
    %c0_i32_0 = arith.constant 0 : i32
    return %c0_i32, %arg0 : i32, i32
  }
  func.func @transform_3(%arg0: i32, %arg1: i32) -> (i32, i32, i32) {
    %c0_i32 = arith.constant 0 : i32
    %c0_i32_0 = arith.constant 0 : i32
    return %arg1, %c0_i32, %arg0 : i32, i32, i32
  }
}

module attributes {stable_mosaic.version = 11 : i64} {
  func.func @_conv3x3_kernel(%arg0: i32, %arg1: i32, %arg2: memref<4x9x9x16xbf16, #tpu.memory_space<vmem>>, %arg3: memref<9x16x16xbf16, #tpu.memory_space<vmem>>, %arg4: memref<1x16xf32, #tpu.memory_space<vmem>>, %arg5: memref<1x64x16xbf16, #tpu.memory_space<vmem>>) attributes {dimension_semantics = [#tpu.dimension_semantics<parallel>, #tpu.dimension_semantics<parallel>], iteration_bounds = array<i64: 1, 2>, scalar_prefetch = 0 : i64, scratch_operands = 0 : i64, tpu.core_type = #tpu.core_type<tc>, window_params = [{transform_indices = @transform_0, window_bounds = array<i64: 4, 9, 9, 16>}, {transform_indices = @transform_1, window_bounds = array<i64: 9, 16, 16>}, {transform_indices = @transform_2, window_bounds = array<i64: 1, 16>}, {transform_indices = @transform_3, window_bounds = array<i64: 1, 64, 16>}]} {
    %c0 = arith.constant 0 : index
    %c0_0 = arith.constant 0 : index
    %c0_1 = arith.constant 0 : index
    %c0_2 = arith.constant 0 : index
    %0 = vector.load %arg2[%c0, %c0_0, %c0_1, %c0_2] : memref<4x9x9x16xbf16, #tpu.memory_space<vmem>>, vector<4x9x9x16xbf16>
    %c0_3 = arith.constant 0 : index
    %c0_4 = arith.constant 0 : index
    %1 = vector.load %arg4[%c0_3, %c0_4] : memref<1x16xf32, #tpu.memory_space<vmem>>, vector<1x16xf32>
    %2 = vector.extract_strided_slice %0 {offsets = [0, 0, 0, 0], sizes = [1, 8, 8, 16], strides = [1, 1, 1, 1]} : vector<4x9x9x16xbf16> to vector<1x8x8x16xbf16>
    %3 = vector.shape_cast %2 : vector<1x8x8x16xbf16> to vector<8x8x16xbf16>
    %4 = vector.shape_cast %3 : vector<8x8x16xbf16> to vector<64x16xbf16>
    %c0_5 = arith.constant 0 : index
    %c0_6 = arith.constant 0 : index
    %c0_7 = arith.constant 0 : index
    %5 = vector.load %arg3[%c0_5, %c0_6, %c0_7] : memref<9x16x16xbf16, #tpu.memory_space<vmem>>, vector<1x16x16xbf16>
    %6 = vector.shape_cast %5 : vector<1x16x16xbf16> to vector<16x16xbf16>
    %cst = arith.constant dense<0.000000e+00> : vector<64x16xf32>
    %7 = tpu.matmul %4, %6, %cst {dimension_numbers = #tpu.dot_dimension_numbers<[1], [0], [0], [1], [0, 0, 1, 1], [], []>} : vector<64x16xbf16>, vector<16x16xbf16>, vector<64x16xf32> -> vector<64x16xf32>
    %8 = vector.broadcast %1 : vector<1x16xf32> to vector<64x16xf32>
    %9 = arith.addf %8, %7 : vector<64x16xf32>
    %10 = vector.extract_strided_slice %0 {offsets = [1, 0, 0, 0], sizes = [1, 8, 8, 16], strides = [1, 1, 1, 1]} : vector<4x9x9x16xbf16> to vector<1x8x8x16xbf16>
    %11 = vector.shape_cast %10 : vector<1x8x8x16xbf16> to vector<8x8x16xbf16>
    %12 = vector.shape_cast %11 : vector<8x8x16xbf16> to vector<64x16xbf16>
    %c1 = arith.constant 1 : index
    %c0_8 = arith.constant 0 : index
    %c0_9 = arith.constant 0 : index
    %13 = vector.load %arg3[%c1, %c0_8, %c0_9] : memref<9x16x16xbf16, #tpu.memory_space<vmem>>, vector<1x16x16xbf16>
    %14 = vector.shape_cast %13 : vector<1x16x16xbf16> to vector<16x16xbf16>
    %cst_10 = arith.constant dense<0.000000e+00> : vector<64x16xf32>
    %15 = tpu.matmul %12, %14, %cst_10 {dimension_numbers = #tpu.dot_dimension_numbers<[1], [0], [0], [1], [0, 0, 1, 1], [], []>} : vector<64x16xbf16>, vector<16x16xbf16>, vector<64x16xf32> -> vector<64x16xf32>
    %16 = arith.addf %9, %15 : vector<64x16xf32>
    %17 = vector.extract_strided_slice %0 {offsets = [0, 0, 1, 0], sizes = [1, 8, 8, 16], strides = [1, 1, 1, 1]} : vector<4x9x9x16xbf16> to vector<1x8x8x16xbf16>
    %18 = vector.shape_cast %17 : vector<1x8x8x16xbf16> to vector<8x8x16xbf16>
    %19 = vector.shape_cast %18 : vector<8x8x16xbf16> to vector<64x16xbf16>
    %c2 = arith.constant 2 : index
    %c0_11 = arith.constant 0 : index
    %c0_12 = arith.constant 0 : index
    %20 = vector.load %arg3[%c2, %c0_11, %c0_12] : memref<9x16x16xbf16, #tpu.memory_space<vmem>>, vector<1x16x16xbf16>
    %21 = vector.shape_cast %20 : vector<1x16x16xbf16> to vector<16x16xbf16>
    %cst_13 = arith.constant dense<0.000000e+00> : vector<64x16xf32>
    %22 = tpu.matmul %19, %21, %cst_13 {dimension_numbers = #tpu.dot_dimension_numbers<[1], [0], [0], [1], [0, 0, 1, 1], [], []>} : vector<64x16xbf16>, vector<16x16xbf16>, vector<64x16xf32> -> vector<64x16xf32>
    %23 = arith.addf %16, %22 : vector<64x16xf32>
    %24 = vector.extract_strided_slice %0 {offsets = [2, 0, 0, 0], sizes = [1, 8, 8, 16], strides = [1, 1, 1, 1]} : vector<4x9x9x16xbf16> to vector<1x8x8x16xbf16>
    %25 = vector.shape_cast %24 : vector<1x8x8x16xbf16> to vector<8x8x16xbf16>
    %26 = vector.shape_cast %25 : vector<8x8x16xbf16> to vector<64x16xbf16>
    %c3 = arith.constant 3 : index
    %c0_14 = arith.constant 0 : index
    %c0_15 = arith.constant 0 : index
    %27 = vector.load %arg3[%c3, %c0_14, %c0_15] : memref<9x16x16xbf16, #tpu.memory_space<vmem>>, vector<1x16x16xbf16>
    %28 = vector.shape_cast %27 : vector<1x16x16xbf16> to vector<16x16xbf16>
    %cst_16 = arith.constant dense<0.000000e+00> : vector<64x16xf32>
    %29 = tpu.matmul %26, %28, %cst_16 {dimension_numbers = #tpu.dot_dimension_numbers<[1], [0], [0], [1], [0, 0, 1, 1], [], []>} : vector<64x16xbf16>, vector<16x16xbf16>, vector<64x16xf32> -> vector<64x16xf32>
    %30 = arith.addf %23, %29 : vector<64x16xf32>
    %31 = vector.extract_strided_slice %0 {offsets = [3, 0, 0, 0], sizes = [1, 8, 8, 16], strides = [1, 1, 1, 1]} : vector<4x9x9x16xbf16> to vector<1x8x8x16xbf16>
    %32 = vector.shape_cast %31 : vector<1x8x8x16xbf16> to vector<8x8x16xbf16>
    %33 = vector.shape_cast %32 : vector<8x8x16xbf16> to vector<64x16xbf16>
    %c4 = arith.constant 4 : index
    %c0_17 = arith.constant 0 : index
    %c0_18 = arith.constant 0 : index
    %34 = vector.load %arg3[%c4, %c0_17, %c0_18] : memref<9x16x16xbf16, #tpu.memory_space<vmem>>, vector<1x16x16xbf16>
    %35 = vector.shape_cast %34 : vector<1x16x16xbf16> to vector<16x16xbf16>
    %cst_19 = arith.constant dense<0.000000e+00> : vector<64x16xf32>
    %36 = tpu.matmul %33, %35, %cst_19 {dimension_numbers = #tpu.dot_dimension_numbers<[1], [0], [0], [1], [0, 0, 1, 1], [], []>} : vector<64x16xbf16>, vector<16x16xbf16>, vector<64x16xf32> -> vector<64x16xf32>
    %37 = arith.addf %30, %36 : vector<64x16xf32>
    %38 = vector.extract_strided_slice %0 {offsets = [2, 0, 1, 0], sizes = [1, 8, 8, 16], strides = [1, 1, 1, 1]} : vector<4x9x9x16xbf16> to vector<1x8x8x16xbf16>
    %39 = vector.shape_cast %38 : vector<1x8x8x16xbf16> to vector<8x8x16xbf16>
    %40 = vector.shape_cast %39 : vector<8x8x16xbf16> to vector<64x16xbf16>
    %c5 = arith.constant 5 : index
    %c0_20 = arith.constant 0 : index
    %c0_21 = arith.constant 0 : index
    %41 = vector.load %arg3[%c5, %c0_20, %c0_21] : memref<9x16x16xbf16, #tpu.memory_space<vmem>>, vector<1x16x16xbf16>
    %42 = vector.shape_cast %41 : vector<1x16x16xbf16> to vector<16x16xbf16>
    %cst_22 = arith.constant dense<0.000000e+00> : vector<64x16xf32>
    %43 = tpu.matmul %40, %42, %cst_22 {dimension_numbers = #tpu.dot_dimension_numbers<[1], [0], [0], [1], [0, 0, 1, 1], [], []>} : vector<64x16xbf16>, vector<16x16xbf16>, vector<64x16xf32> -> vector<64x16xf32>
    %44 = arith.addf %37, %43 : vector<64x16xf32>
    %45 = vector.extract_strided_slice %0 {offsets = [0, 1, 0, 0], sizes = [1, 8, 8, 16], strides = [1, 1, 1, 1]} : vector<4x9x9x16xbf16> to vector<1x8x8x16xbf16>
    %46 = vector.shape_cast %45 : vector<1x8x8x16xbf16> to vector<8x8x16xbf16>
    %47 = vector.shape_cast %46 : vector<8x8x16xbf16> to vector<64x16xbf16>
    %c6 = arith.constant 6 : index
    %c0_23 = arith.constant 0 : index
    %c0_24 = arith.constant 0 : index
    %48 = vector.load %arg3[%c6, %c0_23, %c0_24] : memref<9x16x16xbf16, #tpu.memory_space<vmem>>, vector<1x16x16xbf16>
    %49 = vector.shape_cast %48 : vector<1x16x16xbf16> to vector<16x16xbf16>
    %cst_25 = arith.constant dense<0.000000e+00> : vector<64x16xf32>
    %50 = tpu.matmul %47, %49, %cst_25 {dimension_numbers = #tpu.dot_dimension_numbers<[1], [0], [0], [1], [0, 0, 1, 1], [], []>} : vector<64x16xbf16>, vector<16x16xbf16>, vector<64x16xf32> -> vector<64x16xf32>
    %51 = arith.addf %44, %50 : vector<64x16xf32>
    %52 = vector.extract_strided_slice %0 {offsets = [1, 1, 0, 0], sizes = [1, 8, 8, 16], strides = [1, 1, 1, 1]} : vector<4x9x9x16xbf16> to vector<1x8x8x16xbf16>
    %53 = vector.shape_cast %52 : vector<1x8x8x16xbf16> to vector<8x8x16xbf16>
    %54 = vector.shape_cast %53 : vector<8x8x16xbf16> to vector<64x16xbf16>
    %c7 = arith.constant 7 : index
    %c0_26 = arith.constant 0 : index
    %c0_27 = arith.constant 0 : index
    %55 = vector.load %arg3[%c7, %c0_26, %c0_27] : memref<9x16x16xbf16, #tpu.memory_space<vmem>>, vector<1x16x16xbf16>
    %56 = vector.shape_cast %55 : vector<1x16x16xbf16> to vector<16x16xbf16>
    %cst_28 = arith.constant dense<0.000000e+00> : vector<64x16xf32>
    %57 = tpu.matmul %54, %56, %cst_28 {dimension_numbers = #tpu.dot_dimension_numbers<[1], [0], [0], [1], [0, 0, 1, 1], [], []>} : vector<64x16xbf16>, vector<16x16xbf16>, vector<64x16xf32> -> vector<64x16xf32>
    %58 = arith.addf %51, %57 : vector<64x16xf32>
    %59 = vector.extract_strided_slice %0 {offsets = [0, 1, 1, 0], sizes = [1, 8, 8, 16], strides = [1, 1, 1, 1]} : vector<4x9x9x16xbf16> to vector<1x8x8x16xbf16>
    %60 = vector.shape_cast %59 : vector<1x8x8x16xbf16> to vector<8x8x16xbf16>
    %61 = vector.shape_cast %60 : vector<8x8x16xbf16> to vector<64x16xbf16>
    %c8 = arith.constant 8 : index
    %c0_29 = arith.constant 0 : index
    %c0_30 = arith.constant 0 : index
    %62 = vector.load %arg3[%c8, %c0_29, %c0_30] : memref<9x16x16xbf16, #tpu.memory_space<vmem>>, vector<1x16x16xbf16>
    %63 = vector.shape_cast %62 : vector<1x16x16xbf16> to vector<16x16xbf16>
    %cst_31 = arith.constant dense<0.000000e+00> : vector<64x16xf32>
    %64 = tpu.matmul %61, %63, %cst_31 {dimension_numbers = #tpu.dot_dimension_numbers<[1], [0], [0], [1], [0, 0, 1, 1], [], []>} : vector<64x16xbf16>, vector<16x16xbf16>, vector<64x16xf32> -> vector<64x16xf32>
    %65 = arith.addf %58, %64 : vector<64x16xf32>
    %cst_32 = arith.constant 0.000000e+00 : f32
    %66 = vector.broadcast %cst_32 : f32 to vector<64x16xf32>
    %67 = arith.maximumf %65, %66 : vector<64x16xf32>
    %68 = arith.truncf %67 : vector<64x16xf32> to vector<64x16xbf16>
    %c0_33 = arith.constant 0 : index
    %c0_34 = arith.constant 0 : index
    %c0_35 = arith.constant 0 : index
    %69 = vector.load %arg5[%c0_33, %c0_34, %c0_35] : memref<1x64x16xbf16, #tpu.memory_space<vmem>>, vector<1x64x16xbf16>
    %70 = vector.shape_cast %69 : vector<1x64x16xbf16> to vector<64x16xbf16>
    %71 = vector.shape_cast %68 : vector<64x16xbf16> to vector<1x64x16xbf16>
    tpu.vector_store %arg5[%c0_33, %c0_34, %c0_35], %71 {strides = array<i32>} : memref<1x64x16xbf16, #tpu.memory_space<vmem>>, vector<1x64x16xbf16>,
    return
  }
  func.func @transform_0(%arg0: i32, %arg1: i32) -> (i32, i32, i32, i32) {
    %c0_i32 = arith.constant 0 : i32
    %c0_i32_0 = arith.constant 0 : i32
    %c0_i32_1 = arith.constant 0 : i32
    %c0_i32_2 = arith.constant 0 : i32
    return %arg1, %c0_i32, %c0_i32_0, %c0_i32_1 : i32, i32, i32, i32
  }
  func.func @transform_1(%arg0: i32, %arg1: i32) -> (i32, i32, i32) {
    %c0_i32 = arith.constant 0 : i32
    %c0_i32_0 = arith.constant 0 : i32
    %c0_i32_1 = arith.constant 0 : i32
    return %c0_i32, %c0_i32_0, %arg0 : i32, i32, i32
  }
  func.func @transform_2(%arg0: i32, %arg1: i32) -> (i32, i32) {
    %c0_i32 = arith.constant 0 : i32
    %c0_i32_0 = arith.constant 0 : i32
    return %c0_i32, %arg0 : i32, i32
  }
  func.func @transform_3(%arg0: i32, %arg1: i32) -> (i32, i32, i32) {
    %c0_i32 = arith.constant 0 : i32
    %c0_i32_0 = arith.constant 0 : i32
    return %arg1, %c0_i32, %arg0 : i32, i32, i32
  }
}

module attributes {stable_mosaic.version = 11 : i64} {
  func.func @_matmul_kernel(%arg0: i32, %arg1: i32, %arg2: memref<1x64x32xbf16, #tpu.memory_space<vmem>>, %arg3: memref<32x64xbf16, #tpu.memory_space<vmem>>, %arg4: memref<1x64xf32, #tpu.memory_space<vmem>>, %arg5: memref<1x64x64xbf16, #tpu.memory_space<vmem>>) attributes {dimension_semantics = [#tpu.dimension_semantics<parallel>, #tpu.dimension_semantics<parallel>], iteration_bounds = array<i64: 1, 2>, scalar_prefetch = 0 : i64, scratch_operands = 0 : i64, tpu.core_type = #tpu.core_type<tc>, window_params = [{transform_indices = @transform_0, window_bounds = array<i64: 1, 64, 32>}, {transform_indices = @transform_1, window_bounds = array<i64: 32, 64>}, {transform_indices = @transform_2, window_bounds = array<i64: 1, 64>}, {transform_indices = @transform_3, window_bounds = array<i64: 1, 64, 64>}]} {
    %c0 = arith.constant 0 : index
    %c0_0 = arith.constant 0 : index
    %0 = vector.load %arg4[%c0, %c0_0] : memref<1x64xf32, #tpu.memory_space<vmem>>, vector<1x64xf32>
    %c0_1 = arith.constant 0 : index
    %c0_2 = arith.constant 0 : index
    %c0_3 = arith.constant 0 : index
    %1 = vector.load %arg2[%c0_1, %c0_2, %c0_3] : memref<1x64x32xbf16, #tpu.memory_space<vmem>>, vector<1x64x32xbf16>
    %2 = vector.shape_cast %1 : vector<1x64x32xbf16> to vector<64x32xbf16>
    %c0_4 = arith.constant 0 : index
    %c0_5 = arith.constant 0 : index
    %3 = vector.load %arg3[%c0_4, %c0_5] : memref<32x64xbf16, #tpu.memory_space<vmem>>, vector<32x64xbf16>
    %cst = arith.constant dense<0.000000e+00> : vector<64x64xf32>
    %4 = tpu.matmul %2, %3, %cst {dimension_numbers = #tpu.dot_dimension_numbers<[1], [0], [0], [1], [0, 0, 1, 1], [], []>} : vector<64x32xbf16>, vector<32x64xbf16>, vector<64x64xf32> -> vector<64x64xf32>
    %5 = vector.broadcast %0 : vector<1x64xf32> to vector<64x64xf32>
    %6 = arith.addf %5, %4 : vector<64x64xf32>
    %7 = arith.truncf %6 : vector<64x64xf32> to vector<64x64xbf16>
    %c0_6 = arith.constant 0 : index
    %c0_7 = arith.constant 0 : index
    %c0_8 = arith.constant 0 : index
    %8 = vector.load %arg5[%c0_6, %c0_7, %c0_8] : memref<1x64x64xbf16, #tpu.memory_space<vmem>>, vector<1x64x64xbf16>
    %9 = vector.shape_cast %8 : vector<1x64x64xbf16> to vector<64x64xbf16>
    %10 = vector.shape_cast %7 : vector<64x64xbf16> to vector<1x64x64xbf16>
    tpu.vector_store %arg5[%c0_6, %c0_7, %c0_8], %10 {strides = array<i32>} : memref<1x64x64xbf16, #tpu.memory_space<vmem>>, vector<1x64x64xbf16>,
    return
  }
  func.func @transform_0(%arg0: i32, %arg1: i32) -> (i32, i32, i32) {
    %c0_i32 = arith.constant 0 : i32
    %c0_i32_0 = arith.constant 0 : i32
    %c0_i32_1 = arith.constant 0 : i32
    return %arg1, %c0_i32, %c0_i32_0 : i32, i32, i32
  }
  func.func @transform_1(%arg0: i32, %arg1: i32) -> (i32, i32) {
    %c0_i32 = arith.constant 0 : i32
    %c0_i32_0 = arith.constant 0 : i32
    return %c0_i32, %arg0 : i32, i32
  }
  func.func @transform_2(%arg0: i32, %arg1: i32) -> (i32, i32) {
    %c0_i32 = arith.constant 0 : i32
    %c0_i32_0 = arith.constant 0 : i32
    return %c0_i32, %arg0 : i32, i32
  }
  func.func @transform_3(%arg0: i32, %arg1: i32) -> (i32, i32, i32) {
    %c0_i32 = arith.constant 0 : i32
    %c0_i32_0 = arith.constant 0 : i32
    return %arg1, %c0_i32, %arg0 : i32, i32, i32
  }
}

module attributes {stable_mosaic.version = 11 : i64} {
  func.func @_matmul_kernel(%arg0: i32, %arg1: i32, %arg2: memref<1x64x16xbf16, #tpu.memory_space<vmem>>, %arg3: memref<16x64xbf16, #tpu.memory_space<vmem>>, %arg4: memref<1x64xf32, #tpu.memory_space<vmem>>, %arg5: memref<1x64x64xbf16, #tpu.memory_space<vmem>>, %arg6: memref<1x64x64xbf16, #tpu.memory_space<vmem>>) attributes {dimension_semantics = [#tpu.dimension_semantics<parallel>, #tpu.dimension_semantics<parallel>], iteration_bounds = array<i64: 1, 2>, scalar_prefetch = 0 : i64, scratch_operands = 0 : i64, tpu.core_type = #tpu.core_type<tc>, window_params = [{transform_indices = @transform_0, window_bounds = array<i64: 1, 64, 16>}, {transform_indices = @transform_1, window_bounds = array<i64: 16, 64>}, {transform_indices = @transform_2, window_bounds = array<i64: 1, 64>}, {transform_indices = @transform_3, window_bounds = array<i64: 1, 64, 64>}, {transform_indices = @transform_4, window_bounds = array<i64: 1, 64, 64>}]} {
    %c0 = arith.constant 0 : index
    %c0_0 = arith.constant 0 : index
    %0 = vector.load %arg4[%c0, %c0_0] : memref<1x64xf32, #tpu.memory_space<vmem>>, vector<1x64xf32>
    %c0_1 = arith.constant 0 : index
    %c0_2 = arith.constant 0 : index
    %c0_3 = arith.constant 0 : index
    %1 = vector.load %arg2[%c0_1, %c0_2, %c0_3] : memref<1x64x16xbf16, #tpu.memory_space<vmem>>, vector<1x64x16xbf16>
    %2 = vector.shape_cast %1 : vector<1x64x16xbf16> to vector<64x16xbf16>
    %c0_4 = arith.constant 0 : index
    %c0_5 = arith.constant 0 : index
    %3 = vector.load %arg3[%c0_4, %c0_5] : memref<16x64xbf16, #tpu.memory_space<vmem>>, vector<16x64xbf16>
    %cst = arith.constant dense<0.000000e+00> : vector<64x64xf32>
    %4 = tpu.matmul %2, %3, %cst {dimension_numbers = #tpu.dot_dimension_numbers<[1], [0], [0], [1], [0, 0, 1, 1], [], []>} : vector<64x16xbf16>, vector<16x64xbf16>, vector<64x64xf32> -> vector<64x64xf32>
    %5 = vector.broadcast %0 : vector<1x64xf32> to vector<64x64xf32>
    %6 = arith.addf %5, %4 : vector<64x64xf32>
    %c0_6 = arith.constant 0 : index
    %c0_7 = arith.constant 0 : index
    %c0_8 = arith.constant 0 : index
    %7 = vector.load %arg5[%c0_6, %c0_7, %c0_8] : memref<1x64x64xbf16, #tpu.memory_space<vmem>>, vector<1x64x64xbf16>
    %8 = vector.shape_cast %7 : vector<1x64x64xbf16> to vector<64x64xbf16>
    %9 = arith.extf %8 : vector<64x64xbf16> to vector<64x64xf32>
    %10 = arith.addf %6, %9 : vector<64x64xf32>
    %cst_9 = arith.constant 0.000000e+00 : f32
    %11 = vector.broadcast %cst_9 : f32 to vector<64x64xf32>
    %12 = arith.maximumf %10, %11 : vector<64x64xf32>
    %13 = arith.truncf %12 : vector<64x64xf32> to vector<64x64xbf16>
    %c0_10 = arith.constant 0 : index
    %c0_11 = arith.constant 0 : index
    %c0_12 = arith.constant 0 : index
    %14 = vector.load %arg6[%c0_10, %c0_11, %c0_12] : memref<1x64x64xbf16, #tpu.memory_space<vmem>>, vector<1x64x64xbf16>
    %15 = vector.shape_cast %14 : vector<1x64x64xbf16> to vector<64x64xbf16>
    %16 = vector.shape_cast %13 : vector<64x64xbf16> to vector<1x64x64xbf16>
    tpu.vector_store %arg6[%c0_10, %c0_11, %c0_12], %16 {strides = array<i32>} : memref<1x64x64xbf16, #tpu.memory_space<vmem>>, vector<1x64x64xbf16>,
    return
  }
  func.func @transform_0(%arg0: i32, %arg1: i32) -> (i32, i32, i32) {
    %c0_i32 = arith.constant 0 : i32
    %c0_i32_0 = arith.constant 0 : i32
    %c0_i32_1 = arith.constant 0 : i32
    return %arg1, %c0_i32, %c0_i32_0 : i32, i32, i32
  }
  func.func @transform_1(%arg0: i32, %arg1: i32) -> (i32, i32) {
    %c0_i32 = arith.constant 0 : i32
    %c0_i32_0 = arith.constant 0 : i32
    return %c0_i32, %arg0 : i32, i32
  }
  func.func @transform_2(%arg0: i32, %arg1: i32) -> (i32, i32) {
    %c0_i32 = arith.constant 0 : i32
    %c0_i32_0 = arith.constant 0 : i32
    return %c0_i32, %arg0 : i32, i32
  }
  func.func @transform_3(%arg0: i32, %arg1: i32) -> (i32, i32, i32) {
    %c0_i32 = arith.constant 0 : i32
    %c0_i32_0 = arith.constant 0 : i32
    return %arg1, %c0_i32, %arg0 : i32, i32, i32
  }
  func.func @transform_4(%arg0: i32, %arg1: i32) -> (i32, i32, i32) {
    %c0_i32 = arith.constant 0 : i32
    %c0_i32_0 = arith.constant 0 : i32
    return %arg1, %c0_i32, %arg0 : i32, i32, i32
  }
}

</mosaic_0001>

<bundles_post_ra>
// kernel: _lambda_.4
= control target key start
LH: loop header
LB: loop body
LE: loop exit
PB: predicated region body
PF: predicated region fallthrough
CT: control target
= control target key end

     0   :  { %8 = vsyncpa [#allocation3], 0  ;;  %s1822_s0 = inlined_call_operand.hbm [shape: bf16[2,256,32], index: 0, kind: input, shape index: {}]   ;;  %s1823_s1 = inlined_call_operand.hbm [shape: bf16[32,16], index: 1, kind: input, shape index: {}]   ;;  %s1824_s2 = inlined_call_operand.hbm [shape: f32[1,16], index: 2, kind: input, shape index: {}]   ;;  %s1825_s3 = inlined_call_operand.hbm [shape: bf16[2,256,16], index: 3, kind: output, shape index: {}]  }
   0x1   :  { %10 = vsyncpa [#allocation3 + $0x1], 0 }
   0x2   :  { %11 = vsyncpa [#allocation6], 0 }
   0x3   :  { %12 = vsyncpa [#allocation4], 0 }
   0x4   :  { %14 = vsyncpa [#allocation4 + $0x1], 0  ;;  %s1421_s12 = smov 0   ;;  %s1423_s13 = smov 0  }
   0x5   :  { %s1425_s14 = smov 0   ;;  %s1427_s15 = smov 0  }
   0x6   :  { %s1429_s16 = smov 0   ;;  %s1431_s17 = smov 0  }
   0x7 LB: > { %s936_s18 = sadd.s32 4294967295, %s1391_s17   ;;  %s937_s19 = sadd.s32 4294967294, %s1391_s17   ;;  %s1391_s17 = sphi %s1431_s17, %s20_s17   ;;  %s1387_s16 = sphi %s1429_s16, %s1847_s16   ;;  %s1383_s15 = sphi %s1427_s15, %s1846_s15   ;;  %s1379_s14 = sphi %s1425_s14, %s1845_s14   ;;  %s1375_s13 = sphi %s1423_s13, %s1844_s13   ;;  %s1371_s12 = sphi %s1421_s12, %s1843_s12  }
   0x8   : > { %p52_p0 = scmp.ne.s32.totalorder %s1375_s13, %s1371_s12  ;;  %p1455_p1 = scmp.eq.s32.totalorder %s936_s18, 0 }
   0x9   : > { %p1459_p2 = scmp.eq.s32.totalorder %s936_s18, 1  ;;  %p136_p3 = scmp.eq.s32.totalorder %s937_s19, 1 }
   0xa   : > { %s1830_s20 = scalar_select %p1455_p1, 1, 0 }
   0xb   : > { %p1465_p4 = por %p1455_p1, %p52_p0  ;;  %p938_p5 = scmp.ge.s32.totalorder %s1391_s17, 1 }
   0xc   : > { %p1470_p6 = por %p136_p3, %p52_p0  ;;  %p143_p7 = scmp.lt.s32.totalorder %s1391_s17, 3 }
   0xd   : > { %s1832_s22 = scalar_select %p1465_p4, 1, 0 }
   0xe   : > { %s1833_s23 = scalar_select %p1470_p6, 1, 0 }
   0xf   : > { %p1475_p8 = pnand %p938_p5, %p143_p7  ;;  %s1393_s25 = smov [#allocation5]  }
  0x10   : > { %s157_s26 = sshll.u32 %s1393_s25, 4  ;;  %s1394_s28 = smov [#allocation7]   ;;  %s1479_s26 = int_to_ptr.vmem [resolvable:$true] %s157_s26 }
  0x11   : > { %p1126_p9 = pneg %p1475_p8  ;;  %s173_s29 = sshll.u32 %s1394_s28, 4  ;;  %s1490_s29 = int_to_ptr.vmem [resolvable:$true] %s173_s29 }
  0x12   : > { %s1219_s5 = scalar_lea.hbm %s1823_s1, 256 }
  0x13   : > { %p1486_p11 = pnand %p1126_p9, %p1455_p1  ;;  %p1220_p12 = scmp.ne.s32.totalorder %s1823_s1, %s1219_s5 }
  0x14   : > { %p1226_p5 = scmp.lt.u32.totalorder %s1219_s5, %s1823_s1 }
  0x15   : > { %p1221_p13 = pneg %p1486_p11 }
  0x17   : > { %p1222_p0 = pnand %p1221_p13, %p1220_p12 }
  0x19   : > { %p1223_p3 = pneg %p1222_p0 }
  0x1b   : > { %p1228_p7 = pnand %p1226_p5, %p1223_p3 }
  0x1d   : > { %1231 = shalt.err (!%p1228_p7)
}
  0x1e   : > { %s1232_s10 = scalar_lea.vmem %s1479_s26, 256  ;;  %p1240_p1 = scmp.lt.s32.totalorder %s1479_s26, %s1479_s26 }
  0x1f   : > { %p1233_p9 = scmp.ne.s32.totalorder %s1479_s26, %s1232_s10  ;;  %p1241_p12 = scmp.lt.s32.totalorder %s1232_s10, %s1232_s10 }
  0x21   : > { %p1235_p10 = pnand %p1233_p9, %p1221_p13  ;;  %p1242_p0 = por %p1241_p12, %p1240_p1 }
  0x23   : > { %p1236_p6 = pneg %p1235_p10 }
  0x25   : > { %p1243_p4 = pnand %p1242_p0, %p1236_p6 }
  0x27   : > { %1246 = shalt.err (!%p1243_p4)
}
  0x28   : > { %s1395_s11 = smov 64   ;;  %s1396_s18 = smov 4  }
  0x29   : > { %1129 = dma.hbm_to_vmem [thread:$0]  (!%p1486_p11), %s1823_s1, 256, %s1479_s26, [#allocation6], %s1395_s11, %s1395_s11, %s1396_s18  }
  0x2a   : > { %s1247_s4 = scalar_lea.hbm %s1824_s2, 16 }
  0x2b   : > { %p1248_p1 = scmp.ne.s32.totalorder %s1824_s2, %s1247_s4  ;;  %p1254_p10 = scmp.lt.u32.totalorder %s1247_s4, %s1824_s2 }
  0x2d   : > { %p1250_p4 = pnand %p1248_p1, %p1221_p13 }
  0x2f   : > { %p1251_p6 = pneg %p1250_p4 }
  0x31   : > { %p1256_p3 = pnand %p1254_p10, %p1251_p6 }
  0x33   : > { %1259 = shalt.err (!%p1256_p3)
}
  0x34   : > { %s1260_s26 = scalar_lea.vmem %s1490_s29, 16  ;;  %s1267_s9 = scalar_lea.vmem %s1490_s29, 32 }
  0x35   : > { %p1261_p5 = scmp.ne.s32.totalorder %s1490_s29, %s1260_s26  ;;  %p1268_p12 = scmp.lt.s32.totalorder %s1490_s29, %s1490_s29 }
  0x36   : > { %p1269_p0 = scmp.lt.s32.totalorder %s1267_s9, %s1260_s26 }
  0x37   : > { %p1263_p7 = pnand %p1261_p5, %p1221_p13 }
  0x38   : > { %p1270_p1 = por %p1269_p0, %p1268_p12 }
  0x39   : > { %p1264_p9 = pneg %p1263_p7 }
  0x3b   : > { %p1271_p4 = pnand %p1270_p1, %p1264_p9 }
  0x3d   : > { %1274 = shalt.err (!%p1271_p4)
}
  0x3e   : > { %1132 = dma.hbm_to_vmem [thread:$0]  (!%p1486_p11), %s1824_s2, 16, %s1490_s29, [#allocation6]  }
  0x3f   : > { %s29_s25 = sadd.s32 1, %s1387_s16  ;;  %s39_s28 = sadd.s32 1, %s1379_s14 }
  0x40   : > { %p30_p13 = scmp.ge.s32.totalorder %s29_s25, 2  ;;  %p46_p6 = scmp.ne.s32.totalorder %s1379_s14, %s1375_s13 }
  0x41   : > { %p47_p10 = scmp.eq.s32.totalorder %s1391_s17, 0  ;;  %p1143_p3 = scmp.lt.s32.totalorder %s1391_s17, 2 }
  0x42   : > { %s1849_s25 = smov (%p30_p13, %s29_s25), 0  ;;  %p1558_p7 = por %p1459_p2, %p46_p6 }
  0x43   : > { %p48_p5 = por %p47_p10, %p46_p6  ;;  %s36_s30 = ssub.s32 %s1387_s16, %s1849_s25 }
  0x44   : > { %s1836_s27 = scalar_select %p1558_p7, 1, 0 }
  0x45   : > { %s184_s4 = sand.u32 1, %s1379_s14   ;;  %p37_p9 = scmp.eq.s32.totalorder %s36_s30, 0 }
  0x46   : > { %s942_s29 = sshll.u32 %s184_s4, 7  ;;  %s1022_s5 = sshll.u32 %s1387_s16, 11 }
  0x47   : > { %s1567_s6 = scalar_select %p37_p9, %s1379_s14, %s39_s28  }
  0x48   : > { %s1572_s26 = scalar_lea.hbm %s1822_s0, %s1022_s5  ;;  %s188_s21 = scalar_lea.vmem [#allocation2], %s942_s29 }
  0x49   : > { %s195_s9 = sshll.u32 %s188_s21, 4  ;;  %p1576_p2 = pnand %p1143_p3, %p48_p5  ;;  %s1580_s9 = int_to_ptr.vmem [resolvable:$true] %s195_s9 }
  0x4a   : > { %s1582_s19 = scalar_lea.sflag [#allocation3], %s184_s4  ;;  %s1275_s28 = scalar_lea.hbm %s1572_s26, 2048 }
  0x4b   : > { %p1276_p11 = scmp.ne.s32.totalorder %s1572_s26, %s1275_s28  ;;  %p1277_p12 = pneg %p1576_p2 }
  0x4c   : > { %s1280_s5 = scalar_lea.hbm %s1822_s0, 4096  ;;  %p1281_p4 = scmp.lt.u32.totalorder %s1572_s26, %s1822_s0 }
  0x4d   : > { %p1278_p0 = pnand %p1277_p12, %p1276_p11  ;;  %p1282_p13 = scmp.lt.u32.totalorder %s1280_s5, %s1275_s28 }
  0x4e   : > { %p1284_p10 = scmp.lt.u32.totalorder %s1275_s28, %s1572_s26 }
  0x4f   : > { %p1279_p1 = pneg %p1278_p0  ;;  %p1283_p6 = por %p1282_p13, %p1281_p4 }
  0x51   : > { %p1285_p3 = por %p1284_p10, %p1283_p6 }
  0x53   : > { %p1286_p5 = pnand %p1285_p3, %p1279_p1 }
  0x55   : > { %1289 = shalt.err (!%p1286_p5)
}
  0x56   : > { %s1290_s4 = scalar_lea.vmem %s1580_s9, 2048  ;;  %s1397_s21 = smov [#allocation2]  }
  0x57   : > { %p1291_p9 = scmp.ne.s32.totalorder %s1580_s9, %s1290_s4  ;;  %s1295_s30 = sshll.u32 %s1397_s21, 4  ;;  %s1296_s30 = int_to_ptr.vmem [resolvable:$false] %s1295_s30 }
  0x58   : > { %s1297_s29 = scalar_lea.vmem %s1296_s30, 4096  ;;  %p1298_p7 = scmp.lt.s32.totalorder %s1580_s9, %s1296_s30 }
  0x59   : > { %p1293_p11 = pnand %p1291_p9, %p1277_p12  ;;  %p1299_p4 = scmp.lt.s32.totalorder %s1297_s29, %s1290_s4 }
  0x5b   : > { %p1294_p0 = pneg %p1293_p11  ;;  %p1300_p13 = por %p1299_p4, %p1298_p7 }
  0x5d   : > { %p1301_p6 = pnand %p1300_p13, %p1294_p0 }
  0x5f   : > { %1304 = shalt.err (!%p1301_p6)
}
  0x60   : > { %1136 = dma.hbm_to_vmem [thread:$0]  (!%p1576_p2), %s1572_s26, 2048, %s1580_s9, %s1582_s19, %s1395_s11, %s1395_s11, %s1396_s18  }
  0x61   : > { %207 = sbr.rel (%p1475_p8) target bundleno = 377 (0x179), region = 32  ;;  %s1616_s28 = sand.u32 (!%p1475_p8), 1, %s1375_s13  }
  0x62   : > { %s946_s5 = sshll.u32 (!%p1475_p8), %s1616_s28, 7  ;;  %s210_s7 = scalar_lea.sflag (!%p1475_p8), [#allocation3], %s1616_s28 }
  0x63   : > { %s1622_s10 = scalar_lea.vmem (!%p1475_p8), [#allocation2], %s946_s5  ;;  %p1838_p7 = scmp.ne.s32.totalorder (!%p1475_p8), %s1832_s22, 0 }
  0x68   : > { %1358 = dma.done.wait (%p1838_p7), %s210_s7, 2048  }
  0x69   : > { %1360 = vsyncadd (%p1838_p7), %s210_s7, 4294965248  ;;  %p1839_p2 = scmp.ne.s32.totalorder %s1830_s20, 0 }
  0x6b   : > { %1362 = dma.done.wait (%p1839_p2), [#allocation6], 272  }
  0x6c   : > { %1364 = vsyncadd (%p1839_p2), [#allocation6], 4294967024  ;;  %v1201_v0 = vld [vmem:[#allocation5] sm:$0xff]   ;;  %v1202_v1 = vld [vmem:[#allocation5 + $0x8] sm:$0xff]   ;;  %vm374_vm0 = vcmask 261120   ;;  %vm782_vm1 = vcmask 125952  }
  0x6d   : > { %1074 = vmatprep.subr.bf16.mxu0 %v1201_v0  ;;  %1110 = vmatprep.subr.bf16.mxu1 %v1201_v0  ;;  %v1203_v2 = vld [vmem:[%s1622_s10] sm:$0xff]   ;;  %v1205_v4 = vld [vmem:[%s1622_s10 + $0x8] sm:$0xff]   ;;  %v1207_v6 = vld [vmem:[%s1622_s10 + $0x10] sm:$0xff]   ;;  %s1676_s20 = scalar_lea.vmem [#allocation8], %s946_s5  ;;  %s1055_s22 = sshll.u32 %s1383_s15, 11 }
  0x6e   : > { %1075 = vmatpush3.bf16.msra.mxu0 %v1201_v0  ;;  %1112 = vmatpush3.bf16.msra.mxu1 %v1201_v0  ;;  %v1204_v3 = vld [vmem:[%s1622_s10 + $0x40] sm:$0xff]   ;;  %v1206_v5 = vld [vmem:[%s1622_s10 + $0x48] sm:$0xff]   ;;  %v1208_v7 = vld [vmem:[%s1622_s10 + $0x50] sm:$0xff]   ;;  %s830_s24 = sshll.u32 %s1676_s20, 4  ;;  %s1759_s18 = scalar_lea.hbm %s1825_s3, %s1055_s22  ;;  %s1761_s24 = int_to_ptr.vmem [resolvable:$true] %s830_s24 }
  0x6f   : > { %1076 = vmatprep.subr.bf16.mxu0 %v1202_v1  ;;  %1111 = vmatprep.subr.bf16.mxu1 %v1202_v1  ;;  %v1209_v8 = vld [vmem:[%s1622_s10 + $0x18] sm:$0xff]   ;;  %v1211_v10 = vld [vmem:[%s1622_s10 + $0x20] sm:$0xff]   ;;  %v1213_v12 = vld [vmem:[%s1622_s10 + $0x28] sm:$0xff]   ;;  %s816_s26 = scalar_lea.sflag [#allocation4], %s1616_s28  ;;  %s1305_s9 = scalar_lea.vmem %s1761_s24, 2048 }
  0x70   : > { %1078 = vmatprep.mubr.msk.bf16.mxu0 %vm374_vm0, %v1203_v2  ;;  %1094 = vmatprep.mubr.msk.bf16.mxu1 %vm374_vm0, %v1204_v3  ;;  %v1210_v9 = vld [vmem:[%s1622_s10 + $0x58] sm:$0xff]   ;;  %v1212_v11 = vld [vmem:[%s1622_s10 + $0x60] sm:$0xff]   ;;  %v1214_v13 = vld [vmem:[%s1622_s10 + $0x68] sm:$0xff]   ;;  %p1306_p8 = scmp.ne.s32.totalorder %s1761_s24, %s1305_s9  ;;  %p1840_p12 = scmp.ne.s32.totalorder %s1836_s27, 0 }
  0x71   : > { %v1215_v14 = vld [vmem:[%s1622_s10 + $0x30] sm:$0xff]   ;;  %v1217_v16 = vld [vmem:[%s1622_s10 + $0x38] sm:$0xff]   ;;  %s1398_s19 = smov [#allocation8]  }
  0x72   : > { %1077 = vmatpush3.bf16.msra.mxu0 %v1202_v1  ;;  %1113 = vmatpush3.bf16.msra.mxu1 %v1202_v1  ;;  %v1216_v15 = vld [vmem:[%s1622_s10 + $0x70] sm:$0xff]   ;;  %v1218_v17 = vld [vmem:[%s1622_s10 + $0x78] sm:$0xff]   ;;  %p1307_p1 = pnand %p1306_p8, %p1840_p12  ;;  %s1309_s8 = sshll.u32 %s1398_s19, 4  ;;  %s1310_s8 = int_to_ptr.vmem [resolvable:$false] %s1309_s8 }
  0x73   : > { %v1664_v18 = vld [vmem:[#allocation7] ss:$0 sm:$0xff]  ;;  %s1311_s4 = scalar_lea.vmem %s1310_s8, 4096  ;;  %p1312_p3 = scmp.lt.s32.totalorder %s1761_s24, %s1310_s8 }
  0x74   : > { %p1308_p10 = pneg %p1307_p1  ;;  %p1313_p5 = scmp.lt.s32.totalorder %s1311_s4, %s1305_s9 }
  0x75   : > { %1079 = vmatmul.mubr.msk.bf16.vlgmr.msra.gmra.mrb[0].mxu0 %vm374_vm0, %v1205_v4  ;;  %1095 = vmatmul.mubr.msk.bf16.vlgmr.msra.gmra.mrb[0].mxu1 %vm374_vm0, %v1206_v5 }
  0x76   : > { %1082 = vmatprep.mubr.msk.bf16.mxu0 %vm374_vm0, %v1207_v6  ;;  %1098 = vmatprep.mubr.msk.bf16.mxu1 %vm374_vm0, %v1208_v7  ;;  %p1314_p9 = por %p1313_p5, %p1312_p3 }
  0x78   : > { %p1315_p11 = pnand %p1314_p9, %p1308_p10 }
  0x7d   : > { %1083 = vmatmul.mubr.msk.bf16.gmra.mrb[4].mxu0 %vm374_vm0, %v1209_v8  ;;  %1099 = vmatmul.mubr.msk.bf16.gmra.mrb[4].mxu1 %vm374_vm0, %v1210_v9 }
  0x7e   : > { %1086 = vmatprep.mubr.msk.bf16.mxu0 %vm374_vm0, %v1211_v10  ;;  %1102 = vmatprep.mubr.msk.bf16.mxu1 %vm374_vm0, %v1212_v11 }
  0x85   : > { %1087 = vmatmul.mubr.msk.bf16.gmra.mrb[8].mxu0 %vm374_vm0, %v1213_v12  ;;  %1103 = vmatmul.mubr.msk.bf16.gmra.mrb[8].mxu1 %vm374_vm0, %v1214_v13 }
  0x86   : > { %1090 = vmatprep.mubr.msk.bf16.mxu0 %vm374_vm0, %v1215_v14  ;;  %1106 = vmatprep.mubr.msk.bf16.mxu1 %vm374_vm0, %v1216_v15 }
  0x8d   : > { %1091 = vmatmul.mubr.msk.bf16.gmra.mrb[12].mxu0 %vm374_vm0, %v1217_v16  ;;  %1107 = vmatmul.mubr.msk.bf16.gmra.mrb[12].mxu1 %vm374_vm0, %v1218_v17 }
 0x148   : > { %v1080_v19 = vpop.f32.mrb[0].mxu0  ;;  %v1096_v20 = vpop.f32.mrb[0].mxu1 }
 0x149   : > { %v592_v21 = vadd.f32 %v1080_v19, %v1664_v18  ;;  %v608_v22 = vadd.f32 %v1096_v20, %v1664_v18  ;;  %v457_v23 = vpop.f32.mrb[1].mxu0  ;;  %v521_v24 = vpop.f32.mrb[1].mxu1 }
 0x14a   : > { %v590_v25 = vadd.f32 %v1664_v18, %v457_v23  ;;  %v606_v26 = vadd.f32 %v1664_v18, %v521_v24  ;;  %v1081_v27 = vpop.f32.mrb[2].mxu0  ;;  %v1097_v28 = vpop.f32.mrb[2].mxu1 }
 0x14b   : > { %v624_v29 = vmax.f32 %v592_v21, 0.0  ;;  %v640_v30 = vmax.f32 %v608_v22, 0.0  ;;  %v593_v31 = vadd.f32 %v1081_v27, %v1664_v18  ;;  %v609_v32 = vadd.f32 %v1097_v28, %v1664_v18  ;;  %v460_v33 = vpop.f32.mrb[3].mxu0  ;;  %v524_v34 = vpop.f32.mrb[3].mxu1 }
 0x14c   : > { %v622_v35 = vmax.f32 %v590_v25, 0.0  ;;  %v638_v36 = vmax.f32 %v606_v26, 0.0  ;;  %v591_v37 = vadd.f32 %v1664_v18, %v460_v33  ;;  %v607_v38 = vadd.f32 %v1664_v18, %v524_v34 }
 0x14d   : > { %v1025_v39 = vpack.c.bf16 %v624_v29, %v624_v29  ;;  %v1041_v40 = vpack.c.bf16 %v640_v30, %v640_v30  ;;  %v625_v41 = vmax.f32 %v593_v31, 0.0  ;;  %v641_v42 = vmax.f32 %v609_v32, 0.0 }
 0x14e   : > { %v1023_v43 = vpack.c.bf16 %v622_v35, %v622_v35  ;;  %v1039_v44 = vpack.c.bf16 %v638_v36, %v638_v36  ;;  %v623_v45 = vmax.f32 %v591_v37, 0.0  ;;  %v639_v46 = vmax.f32 %v607_v38, 0.0 }
 0x14f   : > { %785 = vst.msk [vmem:[%s1676_s20 + $0x8] sm:$0xf] %vm782_vm1, %v1025_v39  ;;  %801 = vst.msk [vmem:[%s1676_s20 + $0x48] sm:$0xf] %vm782_vm1, %v1041_v40  ;;  %v1026_v47 = vpack.c.bf16 %v625_v41, %v625_v41  ;;  %v1042_v48 = vpack.c.bf16 %v641_v42, %v641_v42 }
 0x150   : > { %783 = vst.msk [vmem:[%s1676_s20] sm:$0xf] %vm782_vm1, %v1023_v43  ;;  %799 = vst.msk [vmem:[%s1676_s20 + $0x40] sm:$0xf] %vm782_vm1, %v1039_v44  ;;  %v1024_v49 = vpack.c.bf16 %v623_v45, %v623_v45  ;;  %v1040_v50 = vpack.c.bf16 %v639_v46, %v639_v46  ;;  %v1084_v51 = vpop.f32.mrb[4].mxu0  ;;  %v1100_v52 = vpop.f32.mrb[4].mxu1 }
 0x151   : > { %786 = vst.msk [vmem:[%s1676_s20 + $0xc] sm:$0xf] %vm782_vm1, %v1026_v47  ;;  %802 = vst.msk [vmem:[%s1676_s20 + $0x4c] sm:$0xf] %vm782_vm1, %v1042_v48  ;;  %v596_v53 = vadd.f32 %v1084_v51, %v1664_v18  ;;  %v612_v54 = vadd.f32 %v1100_v52, %v1664_v18  ;;  %v473_v55 = vpop.f32.mrb[5].mxu0  ;;  %v537_v56 = vpop.f32.mrb[5].mxu1 }
 0x152   : > { %784 = vst.msk [vmem:[%s1676_s20 + $0x4] sm:$0xf] %vm782_vm1, %v1024_v49  ;;  %800 = vst.msk [vmem:[%s1676_s20 + $0x44] sm:$0xf] %vm782_vm1, %v1040_v50  ;;  %v594_v57 = vadd.f32 %v1664_v18, %v473_v55  ;;  %v610_v58 = vadd.f32 %v1664_v18, %v537_v56  ;;  %v1085_v59 = vpop.f32.mrb[6].mxu0  ;;  %v1101_v60 = vpop.f32.mrb[6].mxu1 }
 0x153   : > { %v628_v61 = vmax.f32 %v596_v53, 0.0  ;;  %v644_v62 = vmax.f32 %v612_v54, 0.0  ;;  %v597_v63 = vadd.f32 %v1085_v59, %v1664_v18  ;;  %v613_v0 = vadd.f32 %v1101_v60, %v1664_v18  ;;  %v476_v1 = vpop.f32.mrb[7].mxu0  ;;  %v540_v2 = vpop.f32.mrb[7].mxu1 }
 0x154   : > { %v626_v3 = vmax.f32 %v594_v57, 0.0  ;;  %v642_v4 = vmax.f32 %v610_v58, 0.0  ;;  %v595_v5 = vadd.f32 %v1664_v18, %v476_v1  ;;  %v611_v6 = vadd.f32 %v1664_v18, %v540_v2 }
 0x155   : > { %v1029_v7 = vpack.c.bf16 %v628_v61, %v628_v61  ;;  %v1045_v8 = vpack.c.bf16 %v644_v62, %v644_v62  ;;  %v629_v9 = vmax.f32 %v597_v63, 0.0  ;;  %v645_v10 = vmax.f32 %v613_v0, 0.0 }
 0x156   : > { %v1027_v11 = vpack.c.bf16 %v626_v3, %v626_v3  ;;  %v1043_v12 = vpack.c.bf16 %v642_v4, %v642_v4  ;;  %v627_v13 = vmax.f32 %v595_v5, 0.0  ;;  %v643_v14 = vmax.f32 %v611_v6, 0.0 }
 0x157   : > { %789 = vst.msk [vmem:[%s1676_s20 + $0x18] sm:$0xf] %vm782_vm1, %v1029_v7  ;;  %805 = vst.msk [vmem:[%s1676_s20 + $0x58] sm:$0xf] %vm782_vm1, %v1045_v8  ;;  %v1030_v15 = vpack.c.bf16 %v629_v9, %v629_v9  ;;  %v1046_v16 = vpack.c.bf16 %v645_v10, %v645_v10 }
 0x158   : > { %787 = vst.msk [vmem:[%s1676_s20 + $0x10] sm:$0xf] %vm782_vm1, %v1027_v11  ;;  %803 = vst.msk [vmem:[%s1676_s20 + $0x50] sm:$0xf] %vm782_vm1, %v1043_v12  ;;  %v1028_v17 = vpack.c.bf16 %v627_v13, %v627_v13  ;;  %v1044_v19 = vpack.c.bf16 %v643_v14, %v643_v14  ;;  %v1088_v20 = vpop.f32.mrb[8].mxu0  ;;  %v1104_v21 = vpop.f32.mrb[8].mxu1 }
 0x159   : > { %790 = vst.msk [vmem:[%s1676_s20 + $0x1c] sm:$0xf] %vm782_vm1, %v1030_v15  ;;  %806 = vst.msk [vmem:[%s1676_s20 + $0x5c] sm:$0xf] %vm782_vm1, %v1046_v16  ;;  %v600_v22 = vadd.f32 %v1088_v20, %v1664_v18  ;;  %v616_v23 = vadd.f32 %v1104_v21, %v1664_v18  ;;  %v489_v24 = vpop.f32.mrb[9].mxu0  ;;  %v553_v25 = vpop.f32.mrb[9].mxu1 }
 0x15a   : > { %788 = vst.msk [vmem:[%s1676_s20 + $0x14] sm:$0xf] %vm782_vm1, %v1028_v17  ;;  %804 = vst.msk [vmem:[%s1676_s20 + $0x54] sm:$0xf] %vm782_vm1, %v1044_v19  ;;  %v598_v26 = vadd.f32 %v1664_v18, %v489_v24  ;;  %v614_v27 = vadd.f32 %v1664_v18, %v553_v25  ;;  %v1089_v28 = vpop.f32.mrb[10].mxu0  ;;  %v1105_v29 = vpop.f32.mrb[10].mxu1 }
 0x15b   : > { %v632_v30 = vmax.f32 %v600_v22, 0.0  ;;  %v648_v31 = vmax.f32 %v616_v23, 0.0  ;;  %v601_v32 = vadd.f32 %v1089_v28, %v1664_v18  ;;  %v617_v33 = vadd.f32 %v1105_v29, %v1664_v18  ;;  %v492_v34 = vpop.f32.mrb[11].mxu0  ;;  %v556_v35 = vpop.f32.mrb[11].mxu1 }
 0x15c   : > { %v630_v36 = vmax.f32 %v598_v26, 0.0  ;;  %v646_v37 = vmax.f32 %v614_v27, 0.0  ;;  %v599_v38 = vadd.f32 %v1664_v18, %v492_v34  ;;  %v615_v39 = vadd.f32 %v1664_v18, %v556_v35 }
 0x15d   : > { %v1033_v40 = vpack.c.bf16 %v632_v30, %v632_v30  ;;  %v1049_v41 = vpack.c.bf16 %v648_v31, %v648_v31  ;;  %v633_v42 = vmax.f32 %v601_v32, 0.0  ;;  %v649_v43 = vmax.f32 %v617_v33, 0.0 }
 0x15e   : > { %v1031_v44 = vpack.c.bf16 %v630_v36, %v630_v36  ;;  %v1047_v45 = vpack.c.bf16 %v646_v37, %v646_v37  ;;  %v631_v46 = vmax.f32 %v599_v38, 0.0  ;;  %v647_v47 = vmax.f32 %v615_v39, 0.0 }
 0x15f   : > { %793 = vst.msk [vmem:[%s1676_s20 + $0x28] sm:$0xf] %vm782_vm1, %v1033_v40  ;;  %809 = vst.msk [vmem:[%s1676_s20 + $0x68] sm:$0xf] %vm782_vm1, %v1049_v41  ;;  %v1034_v48 = vpack.c.bf16 %v633_v42, %v633_v42  ;;  %v1050_v49 = vpack.c.bf16 %v649_v43, %v649_v43 }
 0x160   : > { %791 = vst.msk [vmem:[%s1676_s20 + $0x20] sm:$0xf] %vm782_vm1, %v1031_v44  ;;  %807 = vst.msk [vmem:[%s1676_s20 + $0x60] sm:$0xf] %vm782_vm1, %v1047_v45  ;;  %v1032_v50 = vpack.c.bf16 %v631_v46, %v631_v46  ;;  %v1048_v51 = vpack.c.bf16 %v647_v47, %v647_v47  ;;  %v1092_v52 = vpop.f32.mrb[12].mxu0  ;;  %v1108_v53 = vpop.f32.mrb[12].mxu1 }
 0x161   : > { %794 = vst.msk [vmem:[%s1676_s20 + $0x2c] sm:$0xf] %vm782_vm1, %v1034_v48  ;;  %810 = vst.msk [vmem:[%s1676_s20 + $0x6c] sm:$0xf] %vm782_vm1, %v1050_v49  ;;  %v604_v54 = vadd.f32 %v1092_v52, %v1664_v18  ;;  %v620_v55 = vadd.f32 %v1108_v53, %v1664_v18  ;;  %v505_v56 = vpop.f32.mrb[13].mxu0  ;;  %v569_v57 = vpop.f32.mrb[13].mxu1 }
 0x162   : > { %792 = vst.msk [vmem:[%s1676_s20 + $0x24] sm:$0xf] %vm782_vm1, %v1032_v50  ;;  %808 = vst.msk [vmem:[%s1676_s20 + $0x64] sm:$0xf] %vm782_vm1, %v1048_v51  ;;  %v602_v58 = vadd.f32 %v1664_v18, %v505_v56  ;;  %v618_v59 = vadd.f32 %v1664_v18, %v569_v57  ;;  %v1093_v60 = vpop.f32.mrb[14].mxu0  ;;  %v1109_v61 = vpop.f32.mrb[14].mxu1 }
 0x163   : > { %v636_v62 = vmax.f32 %v604_v54, 0.0  ;;  %v652_v63 = vmax.f32 %v620_v55, 0.0  ;;  %v605_v0 = vadd.f32 %v1093_v60, %v1664_v18  ;;  %v621_v1 = vadd.f32 %v1109_v61, %v1664_v18  ;;  %v508_v2 = vpop.f32.mrb[15].mxu0  ;;  %v572_v3 = vpop.f32.mrb[15].mxu1 }
 0x164   : > { %v634_v4 = vmax.f32 %v602_v58, 0.0  ;;  %v650_v5 = vmax.f32 %v618_v59, 0.0  ;;  %v603_v6 = vadd.f32 %v1664_v18, %v508_v2  ;;  %v619_v7 = vadd.f32 %v1664_v18, %v572_v3 }
 0x165   : > { %v1037_v8 = vpack.c.bf16 %v636_v62, %v636_v62  ;;  %v1053_v9 = vpack.c.bf16 %v652_v63, %v652_v63  ;;  %v637_v10 = vmax.f32 %v605_v0, 0.0  ;;  %v653_v11 = vmax.f32 %v621_v1, 0.0 }
 0x166   : > { %v1035_v12 = vpack.c.bf16 %v634_v4, %v634_v4  ;;  %v1051_v13 = vpack.c.bf16 %v650_v5, %v650_v5  ;;  %v635_v14 = vmax.f32 %v603_v6, 0.0  ;;  %v651_v15 = vmax.f32 %v619_v7, 0.0 }
 0x167   : > { %797 = vst.msk [vmem:[%s1676_s20 + $0x38] sm:$0xf] %vm782_vm1, %v1037_v8  ;;  %813 = vst.msk [vmem:[%s1676_s20 + $0x78] sm:$0xf] %vm782_vm1, %v1053_v9  ;;  %v1038_v18 = vpack.c.bf16 %v637_v10, %v637_v10  ;;  %v1054_v16 = vpack.c.bf16 %v653_v11, %v653_v11 }
 0x168   : > { %795 = vst.msk [vmem:[%s1676_s20 + $0x30] sm:$0xf] %vm782_vm1, %v1035_v12  ;;  %811 = vst.msk [vmem:[%s1676_s20 + $0x70] sm:$0xf] %vm782_vm1, %v1051_v13  ;;  %v1036_v17 = vpack.c.bf16 %v635_v14, %v635_v14  ;;  %v1052_v19 = vpack.c.bf16 %v651_v15, %v651_v15 }
 0x169   : > { %798 = vst.msk [vmem:[%s1676_s20 + $0x3c] sm:$0xf] %vm782_vm1, %v1038_v18  ;;  %814 = vst.msk [vmem:[%s1676_s20 + $0x7c] sm:$0xf] %vm782_vm1, %v1054_v16 }
 0x16a   : > { %796 = vst.msk [vmem:[%s1676_s20 + $0x34] sm:$0xf] %vm782_vm1, %v1036_v17  ;;  %812 = vst.msk [vmem:[%s1676_s20 + $0x74] sm:$0xf] %vm782_vm1, %v1052_v19 }
 0x16b   : > { %1318 = shalt.err (!%p1315_p11)
}
 0x16c   : > { %s1319_s21 = scalar_lea.hbm %s1759_s18, 2048  ;;  %s1323_s5 = scalar_lea.hbm %s1825_s3, 4096 }
 0x16d   : > { %p1320_p0 = scmp.ne.s32.totalorder %s1759_s18, %s1319_s21  ;;  %p1324_p6 = scmp.lt.u32.totalorder %s1759_s18, %s1825_s3 }
 0x16e   : > { %p1325_p7 = scmp.lt.u32.totalorder %s1323_s5, %s1319_s21  ;;  %p1327_p8 = scmp.lt.u32.totalorder %s1319_s21, %s1759_s18 }
 0x16f   : > { %p1321_p4 = pnand %p1320_p0, %p1840_p12 }
 0x170   : > { %p1326_p2 = por %p1325_p7, %p1324_p6 }
 0x171   : > { %p1322_p13 = pneg %p1321_p4 }
 0x172   : > { %p1328_p1 = por %p1327_p8, %p1326_p2 }
 0x174   : > { %p1329_p10 = pnand %p1328_p1, %p1322_p13 }
 0x176   : > { %1332 = shalt.err (!%p1329_p10)
}
 0x177   : > { %s1399_s20 = smov 64   ;;  %s1400_s22 = smov 4  }
 0x178   : > { %1124 = dma.vmem_to_hbm [thread:$0]  (%p1840_p12), %s1761_s24, 2048, %s1759_s18, %s816_s26, %s1399_s20, %s1399_s20, %s1400_s22  }
 0x179 PF: > { %s845_s15 = sand.u32 1, %s1371_s12   ;;  %p1841_p3 = scmp.ne.s32.totalorder %s1833_s23, 0 }
 0x17a   : > { %p1842_p5 = scmp.ge.s32.totalorder %s1391_s17, 2  ;;  %s846_s11 = scalar_lea.sflag [#allocation4], %s845_s15 }
 0x17c   : > { %p1138_p9 = pnand %p1842_p5, %p1841_p3 }
 0x17e   : > { %1366 = dma.done.wait (!%p1138_p9), %s846_s11, 2048  }
 0x17f   : > { %1368 = vsyncadd (!%p1138_p9), %s846_s11, 4294965248  ;;  %s20_s17 = sadd.s32 1, %s1391_s17   ;;  %s1843_s12 = smov %s1375_s13 }
 0x180   : > { %p17_p11 = scmp.ge.s32.totalorder %s20_s17, 4   ;;  %s1844_s13 = smov %s1379_s14 }
 0x181   : > { %s1845_s14 = smov %s1567_s6  ;;  %s1846_s15 = smov %s1387_s16 }
 0x182   : > { %s1847_s16 = smov %s1849_s25  ;;  %19 = sbr.rel (!%p17_p11) target bundleno = 7 (0x7), region = 87 }
 0x189   :  { %851 = vsyncpa [#allocation3], 1 }
 0x18a   :  { %853 = vsyncpa [#allocation3 + $0x1], 1 }
 0x18b   :  { %854 = vsyncpa [#allocation6], 1 }
 0x18c   :  { %855 = vsyncpa [#allocation4], 1 }
 0x18d   :  { %857 = vsyncpa [#allocation4 + $0x1], 1 }

// kernel: _lambda_.6
= control target key start
LH: loop header
LB: loop body
LE: loop exit
PB: predicated region body
PF: predicated region fallthrough
CT: control target
= control target key end

     0   :  { %8 = vsyncpa [#allocation3], 0  ;;  %s1183_s0 = inlined_call_operand.hbm [shape: bf16[2,64,32], index: 0, kind: input, shape index: {}]   ;;  %s1184_s1 = inlined_call_operand.hbm [shape: bf16[32,64], index: 1, kind: input, shape index: {}]   ;;  %s1185_s2 = inlined_call_operand.hbm [shape: f32[1,64], index: 2, kind: input, shape index: {}]   ;;  %s1186_s3 = inlined_call_operand.hbm [shape: bf16[2,64,64], index: 3, kind: output, shape index: {}]  }
   0x1   :  { %10 = vsyncpa [#allocation3 + $0x1], 0 }
   0x2   :  { %11 = vsyncpa [#allocation6], 0 }
   0x3   :  { %12 = vsyncpa [#allocation4], 0 }
   0x4   :  { %14 = vsyncpa [#allocation4 + $0x1], 0  ;;  %s909_s12 = smov 0   ;;  %s911_s13 = smov 0  }
   0x5   :  { %s913_s14 = smov 0   ;;  %s915_s15 = smov 0  }
   0x6   :  { %s917_s16 = smov 0   ;;  %s919_s17 = smov 0  }
   0x7 LB: > { %s544_s18 = sadd.s32 4294967295, %s879_s17   ;;  %s545_s19 = sadd.s32 4294967294, %s879_s17   ;;  %s879_s17 = sphi %s919_s17, %s20_s17   ;;  %s875_s16 = sphi %s917_s16, %s1208_s16   ;;  %s871_s15 = sphi %s915_s15, %s1207_s15   ;;  %s867_s14 = sphi %s913_s14, %s1206_s14   ;;  %s863_s13 = sphi %s911_s13, %s1205_s13   ;;  %s859_s12 = sphi %s909_s12, %s1204_s12  }
   0x8   : > { %p52_p0 = scmp.ne.s32.totalorder %s863_s13, %s859_s12  ;;  %p943_p1 = scmp.eq.s32.totalorder %s544_s18, 0 }
   0x9   : > { %p947_p2 = scmp.eq.s32.totalorder %s544_s18, 1  ;;  %p136_p3 = scmp.eq.s32.totalorder %s545_s19, 1 }
   0xa   : > { %s1191_s20 = scalar_select %p943_p1, 1, 0 }
   0xb   : > { %p953_p4 = por %p943_p1, %p52_p0  ;;  %p546_p5 = scmp.ge.s32.totalorder %s879_s17, 1 }
   0xc   : > { %p958_p6 = por %p136_p3, %p52_p0  ;;  %p143_p7 = scmp.lt.s32.totalorder %s879_s17, 3 }
   0xd   : > { %s1193_s22 = scalar_select %p953_p4, 1, 0 }
   0xe   : > { %s1194_s23 = scalar_select %p958_p6, 1, 0 }
   0xf   : > { %p963_p8 = pnand %p546_p5, %p143_p7  ;;  %s881_s25 = smov [#allocation5]  }
  0x10   : > { %s157_s26 = sshll.u32 %s881_s25, 4  ;;  %s882_s28 = smov [#allocation7]   ;;  %s967_s26 = int_to_ptr.vmem [resolvable:$true] %s157_s26 }
  0x11   : > { %p626_p9 = pneg %p963_p8  ;;  %s173_s29 = sshll.u32 %s882_s28, 4  ;;  %s978_s29 = int_to_ptr.vmem [resolvable:$true] %s173_s29 }
  0x12   : > { %s707_s5 = scalar_lea.hbm %s1184_s1, 256 }
  0x13   : > { %p974_p11 = pnand %p626_p9, %p943_p1  ;;  %p708_p12 = scmp.ne.s32.totalorder %s1184_s1, %s707_s5 }
  0x14   : > { %p714_p5 = scmp.lt.u32.totalorder %s707_s5, %s1184_s1 }
  0x15   : > { %p709_p13 = pneg %p974_p11 }
  0x17   : > { %p710_p0 = pnand %p709_p13, %p708_p12 }
  0x19   : > { %p711_p3 = pneg %p710_p0 }
  0x1b   : > { %p716_p7 = pnand %p714_p5, %p711_p3 }
  0x1d   : > { %719 = shalt.err (!%p716_p7)
}
  0x1e   : > { %s720_s10 = scalar_lea.vmem %s967_s26, 256  ;;  %p728_p1 = scmp.lt.s32.totalorder %s967_s26, %s967_s26 }
  0x1f   : > { %p721_p9 = scmp.ne.s32.totalorder %s967_s26, %s720_s10  ;;  %p729_p12 = scmp.lt.s32.totalorder %s720_s10, %s720_s10 }
  0x21   : > { %p723_p10 = pnand %p721_p9, %p709_p13  ;;  %p730_p0 = por %p729_p12, %p728_p1 }
  0x23   : > { %p724_p6 = pneg %p723_p10 }
  0x25   : > { %p731_p4 = pnand %p730_p0, %p724_p6 }
  0x27   : > { %734 = shalt.err (!%p731_p4)
}
  0x28   : > { %s883_s11 = smov 64   ;;  %s884_s18 = smov 4  }
  0x29   : > { %629 = dma.hbm_to_vmem [thread:$0]  (!%p974_p11), %s1184_s1, 256, %s967_s26, [#allocation6], %s883_s11, %s883_s11, %s884_s18  }
  0x2a   : > { %s735_s4 = scalar_lea.hbm %s1185_s2, 16 }
  0x2b   : > { %p736_p1 = scmp.ne.s32.totalorder %s1185_s2, %s735_s4  ;;  %p742_p10 = scmp.lt.u32.totalorder %s735_s4, %s1185_s2 }
  0x2d   : > { %p738_p4 = pnand %p736_p1, %p709_p13 }
  0x2f   : > { %p739_p6 = pneg %p738_p4 }
  0x31   : > { %p744_p3 = pnand %p742_p10, %p739_p6 }
  0x33   : > { %747 = shalt.err (!%p744_p3)
}
  0x34   : > { %s748_s26 = scalar_lea.vmem %s978_s29, 16  ;;  %s755_s9 = scalar_lea.vmem %s978_s29, 32 }
  0x35   : > { %p749_p5 = scmp.ne.s32.totalorder %s978_s29, %s748_s26  ;;  %p756_p12 = scmp.lt.s32.totalorder %s978_s29, %s978_s29 }
  0x36   : > { %p757_p0 = scmp.lt.s32.totalorder %s755_s9, %s748_s26 }
  0x37   : > { %p751_p7 = pnand %p749_p5, %p709_p13 }
  0x38   : > { %p758_p1 = por %p757_p0, %p756_p12 }
  0x39   : > { %p752_p9 = pneg %p751_p7 }
  0x3b   : > { %p759_p4 = pnand %p758_p1, %p752_p9 }
  0x3d   : > { %762 = shalt.err (!%p759_p4)
}
  0x3e   : > { %632 = dma.hbm_to_vmem [thread:$0]  (!%p974_p11), %s1185_s2, 16, %s978_s29, [#allocation6]  }
  0x3f   : > { %s29_s25 = sadd.s32 1, %s875_s16  ;;  %s39_s28 = sadd.s32 1, %s867_s14 }
  0x40   : > { %p30_p13 = scmp.ge.s32.totalorder %s29_s25, 2  ;;  %p46_p6 = scmp.ne.s32.totalorder %s867_s14, %s863_s13 }
  0x41   : > { %p47_p10 = scmp.eq.s32.totalorder %s879_s17, 0  ;;  %p643_p3 = scmp.lt.s32.totalorder %s879_s17, 2 }
  0x42   : > { %s1210_s25 = smov (%p30_p13, %s29_s25), 0  ;;  %p1046_p7 = por %p947_p2, %p46_p6 }
  0x43   : > { %p48_p5 = por %p47_p10, %p46_p6  ;;  %s36_s30 = ssub.s32 %s875_s16, %s1210_s25 }
  0x44   : > { %s1197_s27 = scalar_select %p1046_p7, 1, 0 }
  0x45   : > { %s184_s4 = sand.u32 1, %s867_s14   ;;  %p37_p9 = scmp.eq.s32.totalorder %s36_s30, 0 }
  0x46   : > { %s550_s29 = sshll.u32 %s184_s4, 5  ;;  %s582_s5 = sshll.u32 %s875_s16, 9 }
  0x47   : > { %s1055_s6 = scalar_select %p37_p9, %s867_s14, %s39_s28  }
  0x48   : > { %s1060_s26 = scalar_lea.hbm %s1183_s0, %s582_s5  ;;  %s188_s21 = scalar_lea.vmem [#allocation2], %s550_s29 }
  0x49   : > { %s195_s9 = sshll.u32 %s188_s21, 4  ;;  %p1064_p2 = pnand %p643_p3, %p48_p5  ;;  %s1068_s9 = int_to_ptr.vmem [resolvable:$true] %s195_s9 }
  0x4a   : > { %s1070_s19 = scalar_lea.sflag [#allocation3], %s184_s4  ;;  %s763_s28 = scalar_lea.hbm %s1060_s26, 512 }
  0x4b   : > { %p764_p11 = scmp.ne.s32.totalorder %s1060_s26, %s763_s28  ;;  %p765_p12 = pneg %p1064_p2 }
  0x4c   : > { %s768_s5 = scalar_lea.hbm %s1183_s0, 1024  ;;  %p769_p4 = scmp.lt.u32.totalorder %s1060_s26, %s1183_s0 }
  0x4d   : > { %p766_p0 = pnand %p765_p12, %p764_p11  ;;  %p770_p13 = scmp.lt.u32.totalorder %s768_s5, %s763_s28 }
  0x4e   : > { %p772_p10 = scmp.lt.u32.totalorder %s763_s28, %s1060_s26 }
  0x4f   : > { %p767_p1 = pneg %p766_p0  ;;  %p771_p6 = por %p770_p13, %p769_p4 }
  0x51   : > { %p773_p3 = por %p772_p10, %p771_p6 }
  0x53   : > { %p774_p5 = pnand %p773_p3, %p767_p1 }
  0x55   : > { %777 = shalt.err (!%p774_p5)
}
  0x56   : > { %s778_s4 = scalar_lea.vmem %s1068_s9, 512  ;;  %s885_s21 = smov [#allocation2]  }
  0x57   : > { %p779_p9 = scmp.ne.s32.totalorder %s1068_s9, %s778_s4  ;;  %s783_s30 = sshll.u32 %s885_s21, 4  ;;  %s784_s30 = int_to_ptr.vmem [resolvable:$false] %s783_s30 }
  0x58   : > { %s785_s29 = scalar_lea.vmem %s784_s30, 1024  ;;  %p786_p7 = scmp.lt.s32.totalorder %s1068_s9, %s784_s30 }
  0x59   : > { %p781_p11 = pnand %p779_p9, %p765_p12  ;;  %p787_p4 = scmp.lt.s32.totalorder %s785_s29, %s778_s4 }
  0x5b   : > { %p782_p0 = pneg %p781_p11  ;;  %p788_p13 = por %p787_p4, %p786_p7 }
  0x5d   : > { %p789_p6 = pnand %p788_p13, %p782_p0 }
  0x5f   : > { %792 = shalt.err (!%p789_p6)
}
  0x60   : > { %636 = dma.hbm_to_vmem [thread:$0]  (!%p1064_p2), %s1060_s26, 512, %s1068_s9, %s1070_s19, %s883_s11, %s883_s11, %s884_s18  }
  0x61   : > { %207 = sbr.rel (%p963_p8) target bundleno = 351 (0x15f), region = 32  ;;  %s1104_s28 = sand.u32 (!%p963_p8), 1, %s863_s13  }
  0x62   : > { %s554_s5 = sshll.u32 (!%p963_p8), %s1104_s28, 5  ;;  %s210_s7 = scalar_lea.sflag (!%p963_p8), [#allocation3], %s1104_s28 }
  0x63   : > { %s213_s10 = scalar_lea.vmem (!%p963_p8), [#allocation2], %s554_s5  ;;  %p1199_p7 = scmp.ne.s32.totalorder (!%p963_p8), %s1193_s22, 0 }
  0x68   : > { %846 = dma.done.wait (%p1199_p7), %s210_s7, 512  }
  0x69   : > { %848 = vsyncadd (%p1199_p7), %s210_s7, 4294966784  ;;  %p1200_p2 = scmp.ne.s32.totalorder %s1191_s20, 0 }
  0x6b   : > { %850 = dma.done.wait (%p1200_p2), [#allocation6], 272  }
  0x6c   : > { %852 = vsyncadd (%p1200_p2), [#allocation6], 4294967024  ;;  %v701_v0 = vld [vmem:[#allocation5] sm:$0xff]   ;;  %v702_v1 = vld [vmem:[#allocation5 + $0x8] sm:$0xff]   ;;  %vm290_vm0 = vcmask 261120   ;;  %vm414_vm1 = vcmask 519168  }
  0x6d   : > { %598 = vmatprep.subr.bf16.mxu0 %v701_v0  ;;  %610 = vmatprep.subr.bf16.mxu1 %v701_v0  ;;  %v703_v2 = vld [vmem:[%s213_s10] sm:$0xff]   ;;  %v704_v3 = vld [vmem:[%s213_s10 + $0x10] sm:$0xff]   ;;  %v705_v4 = vld [vmem:[%s213_s10 + $0x8] sm:$0xff]   ;;  %s591_s20 = sshll.u32 %s871_s15, 9  ;;  %s243_s22 = scalar_lea.vmem [#allocation8], %s554_s5 }
  0x6e   : > { %599 = vmatpush3.bf16.msra.mxu0 %v701_v0  ;;  %612 = vmatpush3.bf16.msra.mxu1 %v701_v0  ;;  %v706_v5 = vld [vmem:[%s213_s10 + $0x18] sm:$0xff]   ;;  %v568_v6 = vld [vmem:[#allocation7] ss:$0 sm:$0xff]  ;;  %s438_s24 = sshll.u32 %s243_s22, 4  ;;  %s1126_s18 = scalar_lea.hbm %s1186_s3, %s591_s20  ;;  %s1128_s24 = int_to_ptr.vmem [resolvable:$true] %s438_s24 }
  0x6f   : > { %600 = vmatprep.subr.bf16.mxu0 %v702_v1  ;;  %611 = vmatprep.subr.bf16.mxu1 %v702_v1  ;;  %s424_s26 = scalar_lea.sflag [#allocation4], %s1104_s28  ;;  %s793_s9 = scalar_lea.vmem %s1128_s24, 512 }
  0x70   : > { %602 = vmatprep.mubr.msk.bf16.mxu0 %vm290_vm0, %v703_v2  ;;  %606 = vmatprep.mubr.msk.bf16.mxu1 %vm290_vm0, %v704_v3  ;;  %p794_p8 = scmp.ne.s32.totalorder %s1128_s24, %s793_s9  ;;  %p1201_p12 = scmp.ne.s32.totalorder %s1197_s27, 0 }
  0x71   : > { %s886_s19 = smov [#allocation8]  }
  0x72   : > { %601 = vmatpush3.bf16.msra.mxu0 %v702_v1  ;;  %613 = vmatpush3.bf16.msra.mxu1 %v702_v1  ;;  %p795_p1 = pnand %p794_p8, %p1201_p12  ;;  %s797_s8 = sshll.u32 %s886_s19, 4  ;;  %s798_s8 = int_to_ptr.vmem [resolvable:$false] %s797_s8 }
  0x73   : > { %s799_s4 = scalar_lea.vmem %s798_s8, 1024  ;;  %p800_p3 = scmp.lt.s32.totalorder %s1128_s24, %s798_s8 }
  0x74   : > { %p796_p10 = pneg %p795_p1  ;;  %p801_p5 = scmp.lt.s32.totalorder %s799_s4, %s793_s9 }
  0x75   : > { %603 = vmatmul.mubr.msk.bf16.vlgmr.msra.gmra.mrb[0].mxu0 %vm290_vm0, %v705_v4  ;;  %607 = vmatmul.mubr.msk.bf16.vlgmr.msra.gmra.mrb[0].mxu1 %vm290_vm0, %v706_v5 }
  0x76   : > { %p802_p9 = por %p801_p5, %p800_p3 }
  0x78   : > { %p803_p11 = pnand %p802_p9, %p796_p10 }
 0x148   : > { %v604_v7 = vpop.f32.mrb[0].mxu0  ;;  %v608_v8 = vpop.f32.mrb[0].mxu1 }
 0x149   : > { %v376_v9 = vadd.f32 %v604_v7, %v568_v6  ;;  %v380_v10 = vadd.f32 %v608_v8, %v568_v6  ;;  %v337_v11 = vpop.f32.mrb[1].mxu0  ;;  %v353_v12 = vpop.f32.mrb[1].mxu1 }
 0x14a   : > { %v374_v13 = vadd.f32 %v568_v6, %v337_v11  ;;  %v378_v14 = vadd.f32 %v568_v6, %v353_v12  ;;  %v605_v15 = vpop.f32.mrb[2].mxu0  ;;  %v609_v16 = vpop.f32.mrb[2].mxu1 }
 0x14b   : > { %v585_v17 = vpack.c.bf16 %v376_v9, %v376_v9  ;;  %v589_v18 = vpack.c.bf16 %v380_v10, %v380_v10  ;;  %v377_v19 = vadd.f32 %v605_v15, %v568_v6  ;;  %v381_v20 = vadd.f32 %v609_v16, %v568_v6  ;;  %v340_v21 = vpop.f32.mrb[3].mxu0  ;;  %v356_v22 = vpop.f32.mrb[3].mxu1 }
 0x14c   : > { %v583_v23 = vpack.c.bf16 %v374_v13, %v374_v13  ;;  %v587_v24 = vpack.c.bf16 %v378_v14, %v378_v14  ;;  %v375_v25 = vadd.f32 %v568_v6, %v340_v21  ;;  %v379_v26 = vadd.f32 %v568_v6, %v356_v22 }
 0x14d   : > { %417 = vst.msk [vmem:[%s243_s22 + $0x8] sm:$0xf] %vm414_vm1, %v585_v17  ;;  %421 = vst.msk [vmem:[%s243_s22 + $0x18] sm:$0xf] %vm414_vm1, %v589_v18  ;;  %v586_v27 = vpack.c.bf16 %v377_v19, %v377_v19  ;;  %v590_v28 = vpack.c.bf16 %v381_v20, %v381_v20 }
 0x14e   : > { %415 = vst.msk [vmem:[%s243_s22] sm:$0xf] %vm414_vm1, %v583_v23  ;;  %419 = vst.msk [vmem:[%s243_s22 + $0x10] sm:$0xf] %vm414_vm1, %v587_v24  ;;  %v584_v29 = vpack.c.bf16 %v375_v25, %v375_v25  ;;  %v588_v30 = vpack.c.bf16 %v379_v26, %v379_v26 }
 0x14f   : > { %418 = vst.msk [vmem:[%s243_s22 + $0xc] sm:$0xf] %vm414_vm1, %v586_v27  ;;  %422 = vst.msk [vmem:[%s243_s22 + $0x1c] sm:$0xf] %vm414_vm1, %v590_v28 }
 0x150   : > { %416 = vst.msk [vmem:[%s243_s22 + $0x4] sm:$0xf] %vm414_vm1, %v584_v29  ;;  %420 = vst.msk [vmem:[%s243_s22 + $0x14] sm:$0xf] %vm414_vm1, %v588_v30 }
 0x151   : > { %806 = shalt.err (!%p803_p11)
}
 0x152   : > { %s807_s21 = scalar_lea.hbm %s1126_s18, 512  ;;  %s811_s5 = scalar_lea.hbm %s1186_s3, 1024 }
 0x153   : > { %p808_p0 = scmp.ne.s32.totalorder %s1126_s18, %s807_s21  ;;  %p812_p6 = scmp.lt.u32.totalorder %s1126_s18, %s1186_s3 }
 0x154   : > { %p813_p7 = scmp.lt.u32.totalorder %s811_s5, %s807_s21  ;;  %p815_p8 = scmp.lt.u32.totalorder %s807_s21, %s1126_s18 }
 0x155   : > { %p809_p4 = pnand %p808_p0, %p1201_p12 }
 0x156   : > { %p814_p2 = por %p813_p7, %p812_p6 }
 0x157   : > { %p810_p13 = pneg %p809_p4 }
 0x158   : > { %p816_p1 = por %p815_p8, %p814_p2 }
 0x15a   : > { %p817_p10 = pnand %p816_p1, %p810_p13 }
 0x15c   : > { %820 = shalt.err (!%p817_p10)
}
 0x15d   : > { %s887_s20 = smov 64   ;;  %s888_s22 = smov 4  }
 0x15e   : > { %624 = dma.vmem_to_hbm [thread:$0]  (%p1201_p12), %s1128_s24, 512, %s1126_s18, %s424_s26, %s887_s20, %s887_s20, %s888_s22  }
 0x15f PF: > { %s453_s15 = sand.u32 1, %s859_s12   ;;  %p1202_p3 = scmp.ne.s32.totalorder %s1194_s23, 0 }
 0x160   : > { %p1203_p5 = scmp.ge.s32.totalorder %s879_s17, 2  ;;  %s454_s11 = scalar_lea.sflag [#allocation4], %s453_s15 }
 0x162   : > { %p638_p9 = pnand %p1203_p5, %p1202_p3 }
 0x164   : > { %854 = dma.done.wait (!%p638_p9), %s454_s11, 512  }
 0x165   : > { %856 = vsyncadd (!%p638_p9), %s454_s11, 4294966784  ;;  %s20_s17 = sadd.s32 1, %s879_s17   ;;  %s1204_s12 = smov %s863_s13 }
 0x166   : > { %p17_p11 = scmp.ge.s32.totalorder %s20_s17, 4   ;;  %s1205_s13 = smov %s867_s14 }
 0x167   : > { %s1206_s14 = smov %s1055_s6  ;;  %s1207_s15 = smov %s875_s16 }
 0x168   : > { %s1208_s16 = smov %s1210_s25  ;;  %19 = sbr.rel (!%p17_p11) target bundleno = 7 (0x7), region = 87 }
 0x16f   :  { %459 = vsyncpa [#allocation3], 1 }
 0x170   :  { %461 = vsyncpa [#allocation3 + $0x1], 1 }
 0x171   :  { %462 = vsyncpa [#allocation6], 1 }
 0x172   :  { %463 = vsyncpa [#allocation4], 1 }
 0x173   :  { %465 = vsyncpa [#allocation4 + $0x1], 1 }

// kernel: _lambda_.5
= control target key start
LH: loop header
LB: loop body
LE: loop exit
PB: predicated region body
PF: predicated region fallthrough
CT: control target
= control target key end

     0   :  { %8 = vsyncpa [#allocation3], 0  ;;  %s2903_s0 = inlined_call_operand.hbm [shape: bf16[8,9,9,16], index: 0, kind: input, shape index: {}]   ;;  %s2904_s1 = inlined_call_operand.hbm [shape: bf16[9,16,16], index: 1, kind: input, shape index: {}]   ;;  %s2905_s2 = inlined_call_operand.hbm [shape: f32[1,16], index: 2, kind: input, shape index: {}]   ;;  %s2906_s3 = inlined_call_operand.hbm [shape: bf16[2,64,16], index: 3, kind: output, shape index: {}]  }
   0x1   :  { %10 = vsyncpa [#allocation3 + $0x1], 0 }
   0x2   :  { %11 = vsyncpa [#allocation6], 0 }
   0x3   :  { %12 = vsyncpa [#allocation4], 0 }
   0x4   :  { %14 = vsyncpa [#allocation4 + $0x1], 0  ;;  %s2334_s12 = smov 0   ;;  %s2336_s13 = smov 0  }
   0x5   :  { %s2338_s14 = smov 0   ;;  %s2340_s15 = smov 0  }
   0x6   :  { %s2342_s16 = smov 0   ;;  %s2344_s17 = smov 0  }
   0x7 LB: > { %s1683_s18 = sadd.s32 4294967295, %s2304_s17   ;;  %s1684_s19 = sadd.s32 4294967294, %s2304_s17   ;;  %s2304_s17 = sphi %s2344_s17, %s20_s17   ;;  %s2300_s16 = sphi %s2342_s16, %s2930_s16   ;;  %s2296_s15 = sphi %s2340_s15, %s2929_s15   ;;  %s2292_s14 = sphi %s2338_s14, %s2928_s14   ;;  %s2288_s13 = sphi %s2336_s13, %s2927_s13   ;;  %s2284_s12 = sphi %s2334_s12, %s2926_s12  }
   0x8   : > { %p52_p0 = scmp.ne.s32.totalorder %s2288_s13, %s2284_s12  ;;  %p2368_p1 = scmp.eq.s32.totalorder %s1683_s18, 0 }
   0x9   : > { %p2372_p2 = scmp.eq.s32.totalorder %s1683_s18, 1  ;;  %p136_p3 = scmp.eq.s32.totalorder %s1684_s19, 1 }
   0xa   : > { %s2911_s20 = scalar_select %p2368_p1, 1, 0 }
   0xb   : > { %p2378_p4 = por %p2368_p1, %p52_p0  ;;  %p1685_p5 = scmp.ge.s32.totalorder %s2304_s17, 1 }
   0xc   : > { %p2383_p6 = por %p136_p3, %p52_p0  ;;  %p143_p7 = scmp.lt.s32.totalorder %s2304_s17, 3 }
   0xd   : > { %s2913_s22 = scalar_select %p2378_p4, 1, 0 }
   0xe   : > { %s2914_s23 = scalar_select %p2383_p6, 1, 0 }
   0xf   : > { %p2388_p8 = pnand %p1685_p5, %p143_p7  ;;  %s2306_s25 = smov [#allocation5]  }
  0x10   : > { %s157_s26 = sshll.u32 %s2306_s25, 4  ;;  %s2307_s28 = smov [#allocation7]   ;;  %s2392_s26 = int_to_ptr.vmem [resolvable:$true] %s157_s26 }
  0x11   : > { %p2024_p9 = pneg %p2388_p8  ;;  %s173_s29 = sshll.u32 %s2307_s28, 4  ;;  %s2403_s29 = int_to_ptr.vmem [resolvable:$true] %s173_s29 }
  0x12   : > { %s2132_s5 = scalar_lea.hbm %s2904_s1, 1152 }
  0x13   : > { %p2399_p11 = pnand %p2024_p9, %p2368_p1  ;;  %p2133_p12 = scmp.ne.s32.totalorder %s2904_s1, %s2132_s5 }
  0x14   : > { %p2139_p5 = scmp.lt.u32.totalorder %s2132_s5, %s2904_s1 }
  0x15   : > { %p2134_p13 = pneg %p2399_p11 }
  0x17   : > { %p2135_p0 = pnand %p2134_p13, %p2133_p12 }
  0x19   : > { %p2136_p3 = pneg %p2135_p0 }
  0x1b   : > { %p2141_p7 = pnand %p2139_p5, %p2136_p3 }
  0x1d   : > { %2144 = shalt.err (!%p2141_p7)
}
  0x1e   : > { %s2145_s10 = scalar_lea.vmem %s2392_s26, 1152  ;;  %p2153_p1 = scmp.lt.s32.totalorder %s2392_s26, %s2392_s26 }
  0x1f   : > { %p2146_p9 = scmp.ne.s32.totalorder %s2392_s26, %s2145_s10  ;;  %p2154_p12 = scmp.lt.s32.totalorder %s2145_s10, %s2145_s10 }
  0x21   : > { %p2148_p10 = pnand %p2146_p9, %p2134_p13  ;;  %p2155_p0 = por %p2154_p12, %p2153_p1 }
  0x23   : > { %p2149_p6 = pneg %p2148_p10 }
  0x25   : > { %p2156_p4 = pnand %p2155_p0, %p2149_p6 }
  0x27   : > { %2159 = shalt.err (!%p2156_p4)
}
  0x28   : > { %s2308_s11 = smov 64   ;;  %s2309_s18 = smov 4  }
  0x29   : > { %2027 = dma.hbm_to_vmem [thread:$0]  (!%p2399_p11), %s2904_s1, 1152, %s2392_s26, [#allocation6], %s2308_s11, %s2308_s11, %s2309_s18  }
  0x2a   : > { %s2160_s4 = scalar_lea.hbm %s2905_s2, 16 }
  0x2b   : > { %p2161_p1 = scmp.ne.s32.totalorder %s2905_s2, %s2160_s4  ;;  %p2167_p10 = scmp.lt.u32.totalorder %s2160_s4, %s2905_s2 }
  0x2d   : > { %p2163_p4 = pnand %p2161_p1, %p2134_p13 }
  0x2f   : > { %p2164_p6 = pneg %p2163_p4 }
  0x31   : > { %p2169_p3 = pnand %p2167_p10, %p2164_p6 }
  0x33   : > { %2172 = shalt.err (!%p2169_p3)
}
  0x34   : > { %s2173_s26 = scalar_lea.vmem %s2403_s29, 16  ;;  %s2180_s9 = scalar_lea.vmem %s2403_s29, 32 }
  0x35   : > { %p2174_p5 = scmp.ne.s32.totalorder %s2403_s29, %s2173_s26  ;;  %p2181_p12 = scmp.lt.s32.totalorder %s2403_s29, %s2403_s29 }
  0x36   : > { %p2182_p0 = scmp.lt.s32.totalorder %s2180_s9, %s2173_s26 }
  0x37   : > { %p2176_p7 = pnand %p2174_p5, %p2134_p13 }
  0x38   : > { %p2183_p1 = por %p2182_p0, %p2181_p12 }
  0x39   : > { %p2177_p9 = pneg %p2176_p7 }
  0x3b   : > { %p2184_p4 = pnand %p2183_p1, %p2177_p9 }
  0x3d   : > { %2187 = shalt.err (!%p2184_p4)
}
  0x3e   : > { %2030 = dma.hbm_to_vmem [thread:$0]  (!%p2399_p11), %s2905_s2, 16, %s2403_s29, [#allocation6]  }
  0x3f   : > { %s29_s25 = sadd.s32 1, %s2300_s16  ;;  %s39_s28 = sadd.s32 1, %s2292_s14 }
  0x40   : > { %p30_p13 = scmp.ge.s32.totalorder %s29_s25, 2  ;;  %p46_p6 = scmp.ne.s32.totalorder %s2292_s14, %s2288_s13 }
  0x41   : > { %p47_p10 = scmp.eq.s32.totalorder %s2304_s17, 0  ;;  %p2041_p3 = scmp.lt.s32.totalorder %s2304_s17, 2 }
  0x42   : > { %s2932_s25 = smov (%p30_p13, %s29_s25), 0  ;;  %p2471_p7 = por %p2372_p2, %p46_p6 }
  0x43   : > { %p48_p5 = por %p47_p10, %p46_p6  ;;  %s36_s30 = ssub.s32 %s2300_s16, %s2932_s25 }
  0x44   : > { %s2917_s27 = scalar_select %p2471_p7, 1, 0 }
  0x45   : > { %s184_s4 = sand.u32 1, %s2292_s14   ;;  %p37_p9 = scmp.eq.s32.totalorder %s36_s30, 0 }
  0x46   : > { %s2009_s29 = smul.u32 288, %s184_s4  ;;  %p2478_p11 = pnand %p2041_p3, %p48_p5 }
  0x47   : > { %s2483_s6 = scalar_select %p37_p9, %s2292_s14, %s39_s28  }
  0x48   : > { %s2010_s7 = smul.u32 4608, %s2300_s16  ;;  %s188_s8 = scalar_lea.vmem [#allocation2], %s2009_s29 }
  0x49   : > { %s196_s26 = sshll.u32 %s188_s8, 4  ;;  %s2493_s19 = scalar_lea.sflag [#allocation3], %s184_s4  ;;  %s2491_s26 = int_to_ptr.vmem [resolvable:$true] %s196_s26 }
  0x4a   : > { %s2489_s10 = scalar_lea.hbm %s2903_s0, %s2010_s7  ;;  %p2190_p12 = pneg %p2478_p11 }
  0x4b   : > { %s2188_s30 = scalar_lea.hbm %s2489_s10, 4608  ;;  %s2193_s7 = scalar_lea.hbm %s2903_s0, 9216 }
  0x4c   : > { %p2189_p2 = scmp.ne.s32.totalorder %s2489_s10, %s2188_s30  ;;  %p2194_p4 = scmp.lt.u32.totalorder %s2489_s10, %s2903_s0 }
  0x4d   : > { %p2195_p13 = scmp.lt.u32.totalorder %s2193_s7, %s2188_s30  ;;  %p2197_p10 = scmp.lt.u32.totalorder %s2188_s30, %s2489_s10 }
  0x4e   : > { %p2191_p0 = pnand %p2190_p12, %p2189_p2 }
  0x4f   : > { %p2196_p6 = por %p2195_p13, %p2194_p4 }
  0x50   : > { %p2192_p1 = pneg %p2191_p0 }
  0x51   : > { %p2198_p3 = por %p2197_p10, %p2196_p6 }
  0x53   : > { %p2199_p5 = pnand %p2198_p3, %p2192_p1 }
  0x55   : > { %2202 = shalt.err (!%p2199_p5)
}
  0x56   : > { %s2203_s4 = scalar_lea.vmem %s2491_s26, 4608  ;;  %s2310_s9 = smov [#allocation2]  }
  0x57   : > { %p2204_p9 = scmp.ne.s32.totalorder %s2491_s26, %s2203_s4  ;;  %s2208_s28 = sshll.u32 %s2310_s9, 4  ;;  %s2209_s28 = int_to_ptr.vmem [resolvable:$false] %s2208_s28 }
  0x58   : > { %s2210_s29 = scalar_lea.vmem %s2209_s28, 9216  ;;  %p2211_p7 = scmp.lt.s32.totalorder %s2491_s26, %s2209_s28 }
  0x59   : > { %p2206_p2 = pnand %p2204_p9, %p2190_p12  ;;  %p2212_p4 = scmp.lt.s32.totalorder %s2210_s29, %s2203_s4 }
  0x5b   : > { %p2207_p0 = pneg %p2206_p2  ;;  %p2213_p13 = por %p2212_p4, %p2211_p7 }
  0x5d   : > { %p2214_p6 = pnand %p2213_p13, %p2207_p0 }
  0x5f   : > { %2217 = shalt.err (!%p2214_p6)
}
  0x60   : > { %2034 = dma.hbm_to_vmem [thread:$0]  (!%p2478_p11), %s2489_s10, 4608, %s2491_s26, %s2493_s19, %s2308_s11, %s2308_s11, %s2309_s18  }
  0x61   : > { %208 = sbr.rel (%p2388_p8) target bundleno = 428 (0x1ac), region = 32  ;;  %s2527_s30 = sand.u32 (!%p2388_p8), 1, %s2288_s13  }
  0x62   : > { %s2011_s7 = smul.u32 (!%p2388_p8), 288, %s2527_s30  ;;  %s211_s8 = scalar_lea.sflag (!%p2388_p8), [#allocation3], %s2527_s30 }
  0x63   : > { %p2919_p7 = scmp.ne.s32.totalorder (!%p2388_p8), %s2913_s22, 0 }
  0x64   : > { %s2531_s21 = scalar_lea.vmem (!%p2388_p8), [#allocation2], %s2011_s7 }
  0x68   : > { %2271 = dma.done.wait (%p2919_p7), %s211_s8, 4608  }
  0x69   : > { %2273 = vsyncadd (%p2919_p7), %s211_s8, 4294962688  ;;  %p2920_p11 = scmp.ne.s32.totalorder %s2911_s20, 0 }
  0x6b   : > { %2275 = dma.done.wait (%p2920_p11), [#allocation6], 1168  }
  0x6c   : > { %2277 = vsyncadd (%p2920_p11), [#allocation6], 4294966128  ;;  %v2099_v0 = vld [vmem:[#allocation5] sm:$0xff]   ;;  %vm327_vm0 = vcmask 130048   ;;  %v2545_v3 = vld [vmem:[%s2531_s21 + $0x8] sm:$0xf] }
  0x6d   : > { %v2541_v1 = vld [vmem:[#allocation5 + $0x20] sm:$0xff]   ;;  %1845 = vmatprep.subr.bf16.mxu1 %v2099_v0  ;;  %v551_v7 = vshrl.u32 %v2545_v3, 16  ;;  %v2104_v8 = vld [vmem:[#allocation5 + $0x8] sm:$0xff]   ;;  %v554_v9 = vshll.u32 %v2545_v3, 16  ;;  %v2554_v11 = vld [vmem:[%s2531_s21 + $0x10] sm:$0xf] }
  0x6e   : > { %v247_v2 = vld [vmem:[%s2531_s21] sm:$0xf]  ;;  %1885 = vmatprep.subr.bf16.mxu0 %v2541_v1  ;;  %1846 = vmatpush3.bf16.msra.mxu1 %v2099_v0  ;;  %v2106_v12 = vld [vmem:[#allocation5 + $0x28] sm:$0xff]   ;;  %v2558_v16 = vld [vmem:[%s2531_s21 + $0x18] sm:$0xf]  ;;  %v565_v17 = vshrl.u32 %v2554_v11, 16 }
  0x6f   : > { %v1696_v4 = vcombine.low %v247_v2, %v2545_v3  ;;  %v537_v5 = vshrl.u32 %v247_v2, 16  ;;  %v540_v6 = vshll.u32 %v247_v2, 16  ;;  %1886 = vmatpush3.bf16.msra.mxu0 %v2541_v1  ;;  %v2102_v10 = vld [vmem:[%s2531_s21 + $0xd8] ss:$8 sps:$4 sm:$0xff]   ;;  %v553_v15 = vrot.slane %v551_v7, 4  ;;  %1855 = vmatprep.subr.bf16.mxu1 %v2104_v8  ;;  %v2566_v22 = vld [vmem:[#allocation5 + $0x30] sm:$0xff]  }
  0x70   : > { %v556_v18 = vrot.slane %v554_v9, 5  ;;  %1887 = vmatprep.mubr.msk.bf16.mxu0 %vm327_vm0, %v2102_v10  ;;  %v1697_v19 = vcombine.low %v2554_v11, %v2558_v16  ;;  %v568_v20 = vshll.u32 %v2554_v11, 16  ;;  %v579_v21 = vshrl.u32 %v2558_v16, 16  ;;  %1895 = vmatprep.subr.bf16.mxu0 %v2106_v12  ;;  %v2105_v29 = vld [vmem:[%s2531_s21 + $0xe8] ss:$8 sps:$4 sm:$0xff]   ;;  %s1695_s20 = sshll.u32 %s2527_s30, 5 }
  0x71   : > { %1847 = vmatprep.mubr.msk.bf16.mxu1 %vm327_vm0, %v1696_v4  ;;  %v539_v13 = vrot.slane %v537_v5, 4  ;;  %v542_v14 = vrot.slane %v540_v6, 5  ;;  %v567_v23 = vrot.slane %v565_v17, 4  ;;  %v582_v24 = vshll.u32 %v2558_v16, 16  ;;  %v2573_v32 = vld [vmem:[%s2531_s21 + $0x20] sm:$0xf] }
  0x72   : > { %v557_v26 = vor.u32 %v556_v18, %v553_v15  ;;  %1848 = vmatmul.mubr.msk.bf16.vlgmr.msra.gmra.mrb[0].mxu1 %vm327_vm0, %v1697_v19  ;;  %v570_v27 = vrot.slane %v568_v20, 5  ;;  %v581_v28 = vrot.slane %v579_v21, 4  ;;  %vm533_vm1 = vsmask.f32 3328  ;;  %1888 = vmatmul.mubr.msk.bf16.vlgmr.msra.gmra.mrb[0].mxu0 %vm327_vm0, %v2105_v29  ;;  %v2576_v33 = vld [vmem:[%s2531_s21 + $0x28] sm:$0xf] }
  0x73   : > { %v543_v25 = vor.u32 %v542_v14, %v539_v13  ;;  %v584_v30 = vrot.slane %v582_v24, 5  ;;  %1856 = vmatpush3.bf16.msra.mxu1 %v2104_v8  ;;  %v2578_v34 = vld [vmem:[#allocation5 + $0x10] sm:$0xff]   ;;  %1896 = vmatpush3.bf16.msra.mxu0 %v2106_v12  ;;  %v1698_v36 = vcombine.low %v2573_v32, %v2576_v33  ;;  %v2586_v38 = vld [vmem:[%s2531_s21 + $0x38] sm:$0xf]  ;;  %vm534_vm2 = vsmask.f32 7440 }
  0x74   : > { %v571_v31 = vor.u32 %v570_v27, %v567_v23  ;;  %v2583_v37 = vld [vmem:[%s2531_s21 + $0x30] sm:$0xf]  ;;  %v2590_v40 = vrot.slane %v557_v26, 4  ;;  %v593_v41 = vshrl.u32 %v2573_v32, 16  ;;  %1905 = vmatprep.subr.bf16.mxu0 %v2566_v22  ;;  %1865 = vmatprep.subr.bf16.mxu1 %v2578_v34  ;;  %v596_v44 = vshll.u32 %v2573_v32, 16  ;;  %vm2632_vm3 = vmor %vm533_vm1, %vm534_vm2  ;;  %v2640_v26 = vld [vmem:[#allocation5 + $0x18] sm:$0xff]  }
  0x75   : > { %v585_v35 = vor.u32 %v584_v30, %v581_v28  ;;  %v2588_v39 = vrot.slane %v543_v25, 4  ;;  %v2594_v42 = vld [vmem:[%s2531_s21 + $0x90] sm:$0xf]  ;;  %1851 = vmatprep.mubr.msk.bf16.mxu1 %vm327_vm0, %v1698_v36  ;;  %v607_v45 = vshrl.u32 %v2576_v33, 16  ;;  %v1699_v46 = vcombine.low %v2583_v37, %v2586_v38  ;;  %v275_v47 = vld [vmem:[%s2531_s21 + $0x94] sm:$0x1] }
  0x76   : > { %v2598_v43 = vrot.slane %v571_v31, 4  ;;  %v610_v49 = vshll.u32 %v2576_v33, 16  ;;  %v2610_v50 = vld [vmem:[%s2531_s21 + $0x98] sm:$0xf]  ;;  %v277_v51 = vld [vmem:[%s2531_s21 + $0x9c] sm:$0x1] }
  0x77   : > { %v2606_v48 = vrot.slane %v585_v35, 4  ;;  %v983_v52 = vshrl.u32 %v2594_v42, 16  ;;  %v986_v53 = vshll.u32 %v2594_v42, 16  ;;  %v992_v54 = vshll.u32 %v275_v47, 16  ;;  %v2617_v56 = vld [vmem:[%s2531_s21 + $0xa0] sm:$0xf] }
  0x78   : > { %v997_v55 = vshrl.u32 %v2610_v50, 16  ;;  %v1000_v57 = vshll.u32 %v2610_v50, 16  ;;  %v1006_v58 = vshll.u32 %v277_v51, 16  ;;  %v279_v59 = vld [vmem:[%s2531_s21 + $0xa4] sm:$0x1]  ;;  %v1011_v6 = vshrl.u32 %v2617_v56, 16 }
  0x79   : > { %v2623_v60 = vld [vmem:[%s2531_s21 + $0xa8] sm:$0xf]  ;;  %v985_v61 = vrot.slane %v983_v52, 4  ;;  %v988_v62 = vrot.slane %v986_v53, 5  ;;  %v994_v63 = vrot.slane %v992_v54, 5  ;;  %v1014_v7 = vshll.u32 %v2617_v56, 16 }
  0x7a   : > { %1852 = vmatmul.mubr.msk.bf16.gmra.mrb[4].mxu1 %vm327_vm0, %v1699_v46  ;;  %v999_v0 = vrot.slane %v997_v55, 4  ;;  %v281_v2 = vld [vmem:[%s2531_s21 + $0xac] sm:$0x1]  ;;  %v1002_v4 = vrot.slane %v1000_v57, 5  ;;  %v1008_v5 = vrot.slane %v1006_v58, 5  ;;  %v1020_v9 = vshll.u32 %v279_v59, 16 }
  0x7b   : > { %v989_v8 = vor.u32 %v988_v62, %v985_v61  ;;  %v1025_v10 = vshrl.u32 %v2623_v60, 16  ;;  %v1028_v12 = vshll.u32 %v2623_v60, 16  ;;  %v1013_v15 = vrot.slane %v1011_v6, 4  ;;  %v265_v19 = vld [vmem:[%s2531_s21 + $0x48] sm:$0xf]  ;;  %s2829_s22 = scalar_lea.vmem [#allocation8], %s1695_s20 }
  0x7c   : > { %v1003_v14 = vor.u32 %v1002_v4, %v999_v0  ;;  %v1016_v17 = vrot.slane %v1014_v7, 5  ;;  %v1034_v18 = vshll.u32 %v281_v2, 16  ;;  %v1022_v21 = vrot.slane %v1020_v9, 5  ;;  %v2638_v25 = vld [vmem:[%s2531_s21 + $0x50] sm:$0xf]  ;;  %s1799_s24 = sshll.u32 %s2296_s15, 9 }
  0x7d   : > { %v990_v20 = vrot.slane %v989_v8, 4  ;;  %v1027_v23 = vrot.slane %v1025_v10, 4  ;;  %v1030_v24 = vrot.slane %v1028_v12, 5  ;;  %v1706_v30 = vcombine.low %v265_v19, %v2638_v25  ;;  %v2644_v31 = vld [vmem:[%s2531_s21 + $0x58] sm:$0xf]  ;;  %s1577_s11 = sshll.u32 %s2829_s22, 4  ;;  %s2846_s26 = scalar_lea.hbm %s2906_s3, %s1799_s24  ;;  %s2848_s11 = int_to_ptr.vmem [resolvable:$true] %s1577_s11 }
  0x7e   : > { %v1004_v27 = vrot.slane %v1003_v14, 4  ;;  %v1017_v28 = vor.u32 %v1016_v17, %v1013_v15  ;;  %v1036_v29 = vrot.slane %v1034_v18, 5  ;;  %v2647_v35 = vld [vmem:[%s2531_s21 + $0x60] sm:$0xf]  ;;  %v2654_v51 = vld [vmem:[%s2531_s21 + $0xb0] sm:$0xf] }
  0x7f   : > { %v995_v36 = vsel %vm2632_vm3, %v990_v20, %v994_v63  ;;  %v1031_v46 = vor.u32 %v1030_v24, %v1027_v23  ;;  %v1707_v47 = vcombine.low %v2644_v31, %v2647_v35  ;;  %1857 = vmatprep.mubr.msk.bf16.mxu1 %vm327_vm0, %v1706_v30  ;;  %v283_v54 = vld [vmem:[%s2531_s21 + $0xb4] sm:$0x1]  ;;  %v2661_v55 = vld [vmem:[%s2531_s21 + $0xb8] sm:$0xf]  ;;  %v1039_v57 = vshrl.u32 %v2654_v51, 16  ;;  %s1563_s15 = scalar_lea.sflag [#allocation4], %s2527_s30 }
  0x80   : > { %v1009_v52 = vsel %vm2632_vm3, %v1004_v27, %v1008_v5  ;;  %v1018_v53 = vrot.slane %v1017_v28, 4  ;;  %v285_v61 = vld [vmem:[%s2531_s21 + $0xbc] sm:$0x1]  ;;  %v1042_v62 = vshll.u32 %v2654_v51, 16  ;;  %v1048_v63 = vshll.u32 %v283_v54, 16  ;;  %s2218_s10 = scalar_lea.vmem %s2848_s11, 512 }
  0x81   : > { %v1742_v58 = vcombine.low %v995_v36, %v1009_v52  ;;  %v1032_v59 = vrot.slane %v1031_v46, 4  ;;  %v1041_v2 = vrot.slane %v1039_v57, 4  ;;  %v1053_v4 = vshrl.u32 %v2661_v55, 16  ;;  %v2673_v6 = vld [vmem:[%s2531_s21 + $0xc0] sm:$0xf]  ;;  %p2219_p8 = scmp.ne.s32.totalorder %s2848_s11, %s2218_s10  ;;  %p2923_p12 = scmp.ne.s32.totalorder %s2917_s27, 0 }
  0x82   : > { %1858 = vmatmul.mubr.msk.bf16.vlgmr.msra.gmra.mrb[0].mxu1 %vm327_vm0, %v1707_v47  ;;  %v1023_v0 = vsel %vm2632_vm3, %v1018_v53, %v1022_v21  ;;  %v1056_v5 = vshll.u32 %v2661_v55, 16  ;;  %v1044_v8 = vrot.slane %v1042_v62, 5  ;;  %v1050_v9 = vrot.slane %v1048_v63, 5  ;;  %v287_v12 = vld [vmem:[%s2531_s21 + $0xc4] sm:$0x1]  ;;  %s2311_s19 = smov [#allocation8]  }
  0x83   : > { %1866 = vmatpush3.bf16.msra.mxu1 %v2578_v34  ;;  %1897 = vmatprep.mubr.msk.bf16.mxu0 %vm327_vm0, %v1742_v58  ;;  %v1037_v7 = vsel %vm2632_vm3, %v1032_v59, %v1036_v29  ;;  %v1062_v10 = vshll.u32 %v285_v61, 16  ;;  %v2679_v34 = vld [vmem:[#allocation5 + $0x38] sm:$0xff]   ;;  %v1055_v15 = vrot.slane %v1053_v4, 4  ;;  %v2683_v18 = vld [vmem:[%s2531_s21 + $0xc8] sm:$0xf]  ;;  %v1067_v23 = vshrl.u32 %v2673_v6, 16  ;;  %p2220_p1 = pnand %p2219_p8, %p2923_p12 }
  0x84   : > { %1875 = vmatprep.subr.bf16.mxu1 %v2640_v26  ;;  %v1743_v14 = vcombine.low %v1023_v0, %v1037_v7  ;;  %v1058_v17 = vrot.slane %v1056_v5, 5  ;;  %v289_v19 = vld [vmem:[%s2531_s21 + $0xcc] sm:$0x1]  ;;  %v1045_v20 = vor.u32 %v1044_v8, %v1041_v2  ;;  %v1070_v24 = vshll.u32 %v2673_v6, 16  ;;  %v2689_v27 = vld [vmem:[%s2531_s21 + $0x68] sm:$0xf] }
  0x85   : > { %v1064_v21 = vrot.slane %v1062_v10, 5  ;;  %v1076_v29 = vshll.u32 %v287_v12, 16  ;;  %v1081_v30 = vshrl.u32 %v2683_v18, 16  ;;  %v1084_v36 = vshll.u32 %v2683_v18, 16  ;;  %v2695_v46 = vld [vmem:[%s2531_s21 + $0x70] sm:$0xf]  ;;  %p2221_p10 = pneg %p2220_p1 }
  0x86   : > { %1898 = vmatmul.mubr.msk.bf16.vlgmr.msra.gmra.mrb[0].mxu0 %vm327_vm0, %v1743_v14  ;;  %v1059_v28 = vor.u32 %v1058_v17, %v1055_v15  ;;  %v1046_v47 = vrot.slane %v1045_v20, 4  ;;  %v1069_v52 = vrot.slane %v1067_v23, 4  ;;  %v1072_v53 = vrot.slane %v1070_v24, 5  ;;  %v2699_v57 = vld [vmem:[%s2531_s21 + $0x78] sm:$0xf]  ;;  %s2222_s4 = sshll.u32 %s2311_s19, 4  ;;  %s2223_s4 = int_to_ptr.vmem [resolvable:$false] %s2222_s4 }
  0x87   : > { %1906 = vmatpush3.bf16.msra.mxu0 %v2566_v22  ;;  %v1090_v54 = vshll.u32 %v289_v19, 16  ;;  %v1078_v59 = vrot.slane %v1076_v29, 5  ;;  %v1083_v61 = vrot.slane %v1081_v30, 4  ;;  %v1086_v62 = vrot.slane %v1084_v36, 5  ;;  %v2702_v63 = vld [vmem:[%s2531_s21 + $0x80] sm:$0xf]  ;;  %p2225_p3 = scmp.lt.s32.totalorder %s2848_s11, %s2223_s4 }
  0x88   : > { %v1060_v58 = vrot.slane %v1059_v28, 4  ;;  %1915 = vmatprep.subr.bf16.mxu0 %v2679_v34  ;;  %v1051_v22 = vsel %vm2632_vm3, %v1046_v47, %v1050_v9  ;;  %v1073_v0 = vor.u32 %v1072_v53, %v1069_v52  ;;  %v1708_v4 = vcombine.low %v2689_v27, %v2695_v46  ;;  %v248_v12 = vld [vmem:[%s2531_s21 + $0x4] sm:$0x1]  ;;  %v250_v14 = vld [vmem:[%s2531_s21 + $0xc] sm:$0x1]  ;;  %s2224_s9 = scalar_lea.vmem %s2223_s4, 1024 }
  0x89   : > { %v1092_v2 = vrot.slane %v1090_v54, 5  ;;  %v1087_v7 = vor.u32 %v1086_v62, %v1083_v61  ;;  %v1709_v8 = vcombine.low %v2699_v57, %v2702_v63  ;;  %v1751_v10 = vcombine.low %v2545_v3, %v2554_v11  ;;  %v252_v15 = vld [vmem:[%s2531_s21 + $0x14] sm:$0x1]  ;;  %v254_v23 = vld [vmem:[%s2531_s21 + $0x1c] sm:$0x1]  ;;  %p2226_p5 = scmp.lt.s32.totalorder %s2224_s9, %s2218_s10 }
  0x8a   : > { %v1065_v5 = vsel %vm2632_vm3, %v1060_v58, %v1064_v21  ;;  %v1074_v17 = vrot.slane %v1073_v0, 4  ;;  %1861 = vmatprep.mubr.msk.bf16.mxu1 %vm327_vm0, %v1708_v4  ;;  %v546_v19 = vshll.u32 %v248_v12, 16  ;;  %v560_v20 = vshll.u32 %v250_v14, 16  ;;  %v256_v58 = vld [vmem:[%s2531_s21 + $0x24] sm:$0x1] }
  0x8b   : > { %v1744_v9 = vcombine.low %v1051_v22, %v1065_v5  ;;  %v621_v21 = vshrl.u32 %v2583_v37, 16  ;;  %v1088_v24 = vrot.slane %v1087_v7, 4  ;;  %1862 = vmatmul.mubr.msk.bf16.gmra.mrb[4].mxu1 %vm327_vm0, %v1709_v8  ;;  %v574_v28 = vshll.u32 %v252_v15, 16  ;;  %v258_v22 = vld [vmem:[%s2531_s21 + $0x2c] sm:$0x1]  ;;  %p2227_p9 = por %p2226_p5, %p2225_p3 }
  0x8c   : > { %v588_v29 = vshll.u32 %v254_v23, 16  ;;  %v624_v3 = vshll.u32 %v2583_v37, 16  ;;  %v1079_v11 = vsel %vm2632_vm3, %v1074_v17, %v1078_v59  ;;  %v548_v30 = vrot.slane %v546_v19, 5  ;;  %v260_v8 = vld [vmem:[%s2531_s21 + $0x34] sm:$0x1] }
  0x8d   : > { %1901 = vmatprep.mubr.msk.bf16.mxu0 %vm327_vm0, %v1744_v9  ;;  %v562_v36 = vrot.slane %v560_v20, 5  ;;  %v635_v47 = vshrl.u32 %v2586_v38, 16  ;;  %v1093_v52 = vsel %vm2632_vm3, %v1088_v24, %v1092_v2  ;;  %v576_v53 = vrot.slane %v574_v28, 5  ;;  %v262_v12 = vld [vmem:[%s2531_s21 + $0x3c] sm:$0x1]  ;;  %p2228_p2 = pnand %p2227_p9, %p2221_p10 }
  0x8e   : > { %v590_v54 = vrot.slane %v588_v29, 5  ;;  %v1745_v61 = vcombine.low %v1079_v11, %v1093_v52  ;;  %v549_v62 = vsel %vm2632_vm3, %v2588_v39, %v548_v30  ;;  %v595_v0 = vrot.slane %v593_v41, 4 }
  0x8f   : > { %v2736_v59 = vsel %vm2632_vm3, %v2590_v40, %v562_v36  ;;  %v638_v2 = vshll.u32 %v2586_v38, 16  ;;  %v2746_v5 = vsel %vm2632_vm3, %v2598_v43, %v576_v53  ;;  %v598_v41 = vrot.slane %v596_v44, 5  ;;  %v263_v53 = vld [vmem:[%s2531_s21 + $0x40] sm:$0xf] }
  0x90   : > { %v1715_v4 = vcombine.low %v549_v62, %v2736_v59  ;;  %v2751_v39 = vsel %vm2632_vm3, %v2606_v48, %v590_v54  ;;  %1902 = vmatmul.mubr.msk.bf16.gmra.mrb[4].mxu0 %vm327_vm0, %v1745_v61  ;;  %v602_v7 = vshll.u32 %v256_v58, 16  ;;  %v1752_v43 = vcombine.low %v2558_v16, %v2573_v32 }
  0x91   : > { %v1716_v40 = vcombine.low %v2746_v5, %v2751_v39  ;;  %1907 = vmatprep.mubr.msk.bf16.mxu0 %vm327_vm0, %v1751_v10  ;;  %v609_v48 = vrot.slane %v607_v45, 4  ;;  %v612_v14 = vrot.slane %v610_v49, 5  ;;  %v616_v15 = vshll.u32 %v258_v22, 16 }
  0x92   : > { %1867 = vmatprep.mubr.msk.bf16.mxu1 %vm327_vm0, %v1715_v4  ;;  %v599_v9 = vor.u32 %v598_v41, %v595_v0  ;;  %v604_v17 = vrot.slane %v602_v7, 5  ;;  %v623_v44 = vrot.slane %v621_v21, 4  ;;  %v626_v19 = vrot.slane %v624_v3, 5 }
  0x93   : > { %1868 = vmatmul.mubr.msk.bf16.vlgmr.msra.gmra.mrb[0].mxu1 %vm327_vm0, %v1716_v40  ;;  %v613_v20 = vor.u32 %v612_v14, %v609_v48  ;;  %v618_v23 = vrot.slane %v616_v15, 5  ;;  %v630_v16 = vshll.u32 %v260_v8, 16  ;;  %v637_v32 = vrot.slane %v635_v47, 4  ;;  %v2123_v47 = vld [vmem:[#allocation5 + $0x40] sm:$0xff]   ;;  %v1705_v8 = vld [vmem:[#allocation7] ss:$0 sm:$0xff] }
  0x94   : > { %1876 = vmatpush3.bf16.msra.mxu1 %v2640_v26  ;;  %v600_v10 = vrot.slane %v599_v9, 4  ;;  %v627_v24 = vor.u32 %v626_v19, %v623_v44  ;;  %v640_v28 = vrot.slane %v638_v2, 5  ;;  %v644_v45 = vshll.u32 %v262_v12, 16 }
  0x95   : > { %v1753_v49 = vcombine.low %v2576_v33, %v2583_v37  ;;  %v614_v29 = vrot.slane %v613_v20, 4  ;;  %v632_v11 = vrot.slane %v630_v16, 5  ;;  %1935 = vmatprep.subr.bf16.mxu1 %v2541_v1  ;;  %v1724_v58 = vcombine.low %v2594_v42, %v2610_v50 }
  0x96   : > { %v605_v21 = vsel %vm2632_vm3, %v600_v10, %v604_v17  ;;  %v628_v3 = vrot.slane %v627_v24, 4  ;;  %v641_v30 = vor.u32 %v640_v28, %v637_v32  ;;  %v646_v36 = vrot.slane %v644_v45, 5 }
  0x97   : > { %v619_v26 = vsel %vm2632_vm3, %v614_v29, %v618_v23  ;;  %v1754_v62 = vcombine.low %v2586_v38, %v263_v53  ;;  %v1725_v22 = vcombine.low %v2617_v56, %v2623_v60  ;;  %v1726_v42 = vcombine.low %v2654_v51, %v2661_v55  ;;  %v273_v60 = vld [vmem:[%s2531_s21 + $0x88] sm:$0xf] }
  0x98   : > { %1908 = vmatmul.mubr.msk.bf16.vlgmr.msra.gmra.mrb[0].mxu0 %vm327_vm0, %v1752_v43  ;;  %v1717_v52 = vcombine.low %v605_v21, %v619_v26  ;;  %v633_v33 = vsel %vm2632_vm3, %v628_v3, %v632_v11  ;;  %v642_v37 = vrot.slane %v641_v30, 4  ;;  %v1761_v38 = vcombine.low %v2647_v35, %v2689_v27  ;;  %v2130_v35 = vld [vmem:[%s2531_s21 + $0xf8] ss:$8 sps:$4 sm:$0xff]  }
  0x99   : > { %1916 = vmatpush3.bf16.msra.mxu0 %v2679_v34  ;;  %1911 = vmatprep.mubr.msk.bf16.mxu0 %vm327_vm0, %v1753_v49  ;;  %v1760_v34 = vcombine.low %v2638_v25, %v2644_v31  ;;  %v1762_v50 = vcombine.low %v2695_v46, %v2699_v57  ;;  %v1401_v25 = vshrl.u32 %v263_v53, 16  ;;  %v1404_v56 = vshll.u32 %v263_v53, 16  ;;  %v264_v46 = vld [vmem:[%s2531_s21 + $0x44] sm:$0x1] }
  0x9a   : > { %1871 = vmatprep.mubr.msk.bf16.mxu1 %vm327_vm0, %v1717_v52  ;;  %v647_v54 = vsel %vm2632_vm3, %v642_v37, %v646_v36  ;;  %1925 = vmatprep.subr.bf16.mxu0 %v2123_v47  ;;  %v1727_v31 = vcombine.low %v2673_v6, %v2683_v18  ;;  %v1763_v51 = vcombine.low %v2702_v63, %v273_v60  ;;  %v1410_v0 = vshll.u32 %v264_v46, 16  ;;  %v2131_v63 = vld [vmem:[%s2531_s21 + $0x108] ss:$8 sps:$4 sm:$0xff]  }
  0x9b   : > { %v1718_v61 = vcombine.low %v633_v33, %v647_v54  ;;  %v1403_v55 = vrot.slane %v1401_v25, 4  ;;  %v1769_v27 = vcombine.low %v2736_v59, %v2746_v5  ;;  %v1770_v6 = vcombine.low %v2751_v39, %v605_v21 }
  0x9c   : > { %v1771_v18 = vcombine.low %v619_v26, %v633_v33  ;;  %v1412_v4 = vrot.slane %v1410_v0, 5  ;;  %vm1553_vm4 = vcmask 125952  }
  0x9d   : > { %1872 = vmatmul.mubr.msk.bf16.gmra.mrb[4].mxu1 %vm327_vm0, %v1718_v61 }
  0x9e   : > { %1877 = vmatprep.mubr.msk.bf16.mxu1 %vm327_vm0, %v1724_v58 }
  0xa0   : > { %1912 = vmatmul.mubr.msk.bf16.gmra.mrb[4].mxu0 %vm327_vm0, %v1754_v62 }
  0xa1   : > { %1917 = vmatprep.mubr.msk.bf16.mxu0 %vm327_vm0, %v1760_v34 }
  0xa5   : > { %1878 = vmatmul.mubr.msk.bf16.vlgmr.msra.gmra.mrb[0].mxu1 %vm327_vm0, %v1725_v22 }
  0xa6   : > { %1936 = vmatpush3.bf16.msra.mxu1 %v2541_v1  ;;  %1881 = vmatprep.mubr.msk.bf16.mxu1 %vm327_vm0, %v1726_v42  ;;  %v1406_v1 = vrot.slane %v1404_v56, 5 }
  0xa8   : > { %1918 = vmatmul.mubr.msk.bf16.vlgmr.msra.gmra.mrb[0].mxu0 %vm327_vm0, %v1761_v38  ;;  %v1407_v57 = vor.u32 %v1406_v1, %v1403_v55 }
  0xa9   : > { %1926 = vmatpush3.bf16.msra.mxu0 %v2123_v47  ;;  %1921 = vmatprep.mubr.msk.bf16.mxu0 %vm327_vm0, %v1762_v50 }
  0xaa   : > { %v1408_v2 = vrot.slane %v1407_v57, 4 }
  0xac   : > { %v1413_v59 = vsel %vm2632_vm3, %v1408_v2, %v1412_v4 }
  0xad   : > { %1882 = vmatmul.mubr.msk.bf16.gmra.mrb[4].mxu1 %vm327_vm0, %v1727_v31  ;;  %v1772_v5 = vcombine.low %v647_v54, %v1413_v59 }
  0xae   : > { %1891 = vmatprep.mubr.msk.bf16.mxu1 %vm327_vm0, %v2130_v35 }
  0xb0   : > { %1922 = vmatmul.mubr.msk.bf16.gmra.mrb[4].mxu0 %vm327_vm0, %v1763_v51 }
  0xb1   : > { %1927 = vmatprep.mubr.msk.bf16.mxu0 %vm327_vm0, %v1769_v27 }
  0xb8   : > { %1928 = vmatmul.mubr.msk.bf16.vlgmr.msra.gmra.mrb[0].mxu0 %vm327_vm0, %v1770_v6 }
  0xb9   : > { %1931 = vmatprep.mubr.msk.bf16.mxu0 %vm327_vm0, %v1771_v18  ;;  %1892 = vmatmul.mubr.msk.bf16.vlgmr.msra.gmra.mrb[4].mxu1 %vm327_vm0, %v2131_v63 }
  0xc0   : > { %1932 = vmatmul.mubr.msk.bf16.gmra.mrb[4].mxu0 %vm327_vm0, %v1772_v5 }
 0x178   : > { %v1879_v40 = vpop.f32.mrb[0].mxu1 }
 0x179   : > { %v829_v41 = vpop.f32.mrb[1].mxu1  ;;  %v1937_v12 = vadd.f32 %v1879_v40, %v1705_v8 }
 0x17a   : > { %v1880_v39 = vpop.f32.mrb[2].mxu1  ;;  %v1939_v43 = vadd.f32 %v1705_v8, %v829_v41 }
 0x17b   : > { %v832_v7 = vpop.f32.mrb[3].mxu1  ;;  %v1941_v14 = vadd.f32 %v1880_v39, %v1705_v8 }
 0x17c   : > { %v1943_v44 = vadd.f32 %v1705_v8, %v832_v7 }
 0x18b   : > { %v1929_v48 = vpop.f32.mrb[0].mxu0 }
 0x18c   : > { %v1938_v15 = vadd.f32 %v1937_v12, %v1929_v48  ;;  %v1474_v9 = vpop.f32.mrb[1].mxu0  ;;  %v1893_v17 = vpop.f32.mrb[4].mxu1 }
 0x18d   : > { %v1940_v19 = vadd.f32 %v1939_v43, %v1474_v9  ;;  %v1930_v13 = vpop.f32.mrb[2].mxu0  ;;  %v959_v20 = vpop.f32.mrb[5].mxu1  ;;  %v1945_v11 = vadd.f32 %v1893_v17, %v1705_v8 }
 0x18e   : > { %v1515_v23 = vmax.f32 %v1938_v15, 0.0  ;;  %v1942_v16 = vadd.f32 %v1941_v14, %v1930_v13  ;;  %v1477_v32 = vpop.f32.mrb[3].mxu0  ;;  %v1894_v10 = vpop.f32.mrb[6].mxu1  ;;  %v1947_v30 = vadd.f32 %v1705_v8, %v959_v20 }
 0x18f   : > { %v1513_v24 = vmax.f32 %v1940_v19, 0.0  ;;  %v1944_v28 = vadd.f32 %v1943_v44, %v1477_v32  ;;  %v962_v45 = vpop.f32.mrb[7].mxu1  ;;  %v1949_v47 = vadd.f32 %v1894_v10, %v1705_v8 }
 0x190   : > { %v1793_v49 = vpack.c.bf16 %v1515_v23, %v1515_v23  ;;  %v1516_v29 = vmax.f32 %v1942_v16, 0.0  ;;  %v1951_v33 = vadd.f32 %v1705_v8, %v962_v45 }
 0x191   : > { %v1791_v21 = vpack.c.bf16 %v1513_v24, %v1513_v24  ;;  %v1514_v3 = vmax.f32 %v1944_v28, 0.0 }
 0x192   : > { %1556 = vst.msk [vmem:[%s2829_s22 + $0x8] sm:$0xf] %vm1553_vm4, %v1793_v49  ;;  %v1794_v36 = vpack.c.bf16 %v1516_v29, %v1516_v29 }
 0x193   : > { %1554 = vst.msk [vmem:[%s2829_s22] sm:$0xf] %vm1553_vm4, %v1791_v21  ;;  %v1792_v26 = vpack.c.bf16 %v1514_v3, %v1514_v3  ;;  %v1933_v52 = vpop.f32.mrb[4].mxu0 }
 0x194   : > { %1557 = vst.msk [vmem:[%s2829_s22 + $0xc] sm:$0xf] %vm1553_vm4, %v1794_v36  ;;  %v1946_v37 = vadd.f32 %v1945_v11, %v1933_v52  ;;  %v1490_v53 = vpop.f32.mrb[5].mxu0 }
 0x195   : > { %1555 = vst.msk [vmem:[%s2829_s22 + $0x4] sm:$0xf] %vm1553_vm4, %v1792_v26  ;;  %v1948_v54 = vadd.f32 %v1947_v30, %v1490_v53  ;;  %v1934_v58 = vpop.f32.mrb[6].mxu0 }
 0x196   : > { %v1519_v61 = vmax.f32 %v1946_v37, 0.0  ;;  %v1950_v62 = vadd.f32 %v1949_v47, %v1934_v58  ;;  %v1493_v34 = vpop.f32.mrb[7].mxu0 }
 0x197   : > { %v1517_v22 = vmax.f32 %v1948_v54, 0.0  ;;  %v1952_v42 = vadd.f32 %v1951_v33, %v1493_v34 }
 0x198   : > { %v1797_v38 = vpack.c.bf16 %v1519_v61, %v1519_v61  ;;  %v1520_v50 = vmax.f32 %v1950_v62, 0.0 }
 0x199   : > { %v1795_v25 = vpack.c.bf16 %v1517_v22, %v1517_v22  ;;  %v1518_v56 = vmax.f32 %v1952_v42, 0.0 }
 0x19a   : > { %1560 = vst.msk [vmem:[%s2829_s22 + $0x18] sm:$0xf] %vm1553_vm4, %v1797_v38  ;;  %v1798_v60 = vpack.c.bf16 %v1520_v50, %v1520_v50 }
 0x19b   : > { %1558 = vst.msk [vmem:[%s2829_s22 + $0x10] sm:$0xf] %vm1553_vm4, %v1795_v25  ;;  %v1796_v31 = vpack.c.bf16 %v1518_v56, %v1518_v56 }
 0x19c   : > { %1561 = vst.msk [vmem:[%s2829_s22 + $0x1c] sm:$0xf] %vm1553_vm4, %v1798_v60 }
 0x19d   : > { %1559 = vst.msk [vmem:[%s2829_s22 + $0x14] sm:$0xf] %vm1553_vm4, %v1796_v31 }
 0x19e   : > { %2231 = shalt.err (!%p2228_p2)
}
 0x19f   : > { %s2232_s28 = scalar_lea.hbm %s2846_s26, 512  ;;  %s2236_s8 = scalar_lea.hbm %s2906_s3, 1024 }
 0x1a0   : > { %p2233_p0 = scmp.ne.s32.totalorder %s2846_s26, %s2232_s28  ;;  %p2237_p6 = scmp.lt.u32.totalorder %s2846_s26, %s2906_s3 }
 0x1a1   : > { %p2238_p7 = scmp.lt.u32.totalorder %s2236_s8, %s2232_s28  ;;  %p2240_p8 = scmp.lt.u32.totalorder %s2232_s28, %s2846_s26 }
 0x1a2   : > { %p2234_p4 = pnand %p2233_p0, %p2923_p12 }
 0x1a3   : > { %p2239_p11 = por %p2238_p7, %p2237_p6 }
 0x1a4   : > { %p2235_p13 = pneg %p2234_p4 }
 0x1a5   : > { %p2241_p1 = por %p2240_p8, %p2239_p11 }
 0x1a7   : > { %p2242_p10 = pnand %p2241_p1, %p2235_p13 }
 0x1a9   : > { %2245 = shalt.err (!%p2242_p10)
}
 0x1aa   : > { %s2312_s22 = smov 64   ;;  %s2313_s24 = smov 4  }
 0x1ab   : > { %2022 = dma.vmem_to_hbm [thread:$0]  (%p2923_p12), %s2848_s11, 512, %s2846_s26, %s1563_s15, %s2312_s22, %s2312_s22, %s2313_s24  }
 0x1ac PF: > { %s1592_s18 = sand.u32 1, %s2284_s12   ;;  %p2924_p3 = scmp.ne.s32.totalorder %s2914_s23, 0 }
 0x1ad   : > { %p2925_p5 = scmp.ge.s32.totalorder %s2304_s17, 2  ;;  %s1593_s5 = scalar_lea.sflag [#allocation4], %s1592_s18 }
 0x1af   : > { %p2036_p9 = pnand %p2925_p5, %p2924_p3 }
 0x1b1   : > { %2279 = dma.done.wait (!%p2036_p9), %s1593_s5, 512  }
 0x1b2   : > { %2281 = vsyncadd (!%p2036_p9), %s1593_s5, 4294966784  ;;  %s20_s17 = sadd.s32 1, %s2304_s17   ;;  %s2926_s12 = smov %s2288_s13 }
 0x1b3   : > { %p17_p2 = scmp.ge.s32.totalorder %s20_s17, 4   ;;  %s2927_s13 = smov %s2292_s14 }
 0x1b4   : > { %s2928_s14 = smov %s2483_s6  ;;  %s2929_s15 = smov %s2300_s16 }
 0x1b5   : > { %s2930_s16 = smov %s2932_s25  ;;  %19 = sbr.rel (!%p17_p2) target bundleno = 7 (0x7), region = 95 }
 0x1bc   :  { %1598 = vsyncpa [#allocation3], 1 }
 0x1bd   :  { %1600 = vsyncpa [#allocation3 + $0x1], 1 }
 0x1be   :  { %1601 = vsyncpa [#allocation6], 1 }
 0x1bf   :  { %1602 = vsyncpa [#allocation4], 1 }
 0x1c0   :  { %1604 = vsyncpa [#allocation4 + $0x1], 1 }

// kernel: _lambda_.7
= control target key start
LH: loop header
LB: loop body
LE: loop exit
PB: predicated region body
PF: predicated region fallthrough
CT: control target
= control target key end

     0   :  { %s1417_s0 = inlined_call_operand.hbm [shape: bf16[2,64,16], index: 0, kind: input, shape index: {}]   ;;  %s1418_s1 = inlined_call_operand.hbm [shape: bf16[16,64], index: 1, kind: input, shape index: {}]   ;;  %s1419_s2 = inlined_call_operand.hbm [shape: f32[1,64], index: 2, kind: input, shape index: {}]   ;;  %s1420_s3 = inlined_call_operand.hbm [shape: bf16[2,64,64], index: 3, kind: input, shape index: {}]   ;;  %s1421_s4 = inlined_call_operand.hbm [shape: bf16[2,64,64], index: 4, kind: output, shape index: {}]  }
   0x1   :  { %1428 = sst [smem:[#allocation15_spill]] %s1417_s0 }
   0x2   :  { %1429 = sst [smem:[#allocation16_spill]] %s1418_s1 }
   0x3   :  { %1430 = sst [smem:[#allocation17_spill]] %s1419_s2 }
   0x4   :  { %9 = vsyncpa [#allocation3], 0 }
   0x5   :  { %11 = vsyncpa [#allocation3 + $0x1], 0 }
   0x6   :  { %12 = vsyncpa [#allocation6], 0 }
   0x7   :  { %13 = vsyncpa [#allocation9], 0 }
   0x8   :  { %15 = vsyncpa [#allocation9 + $0x1], 0 }
   0x9   :  { %16 = vsyncpa [#allocation4], 0 }
   0xa   :  { %18 = vsyncpa [#allocation4 + $0x1], 0  ;;  %s1090_s15 = smov 0   ;;  %s1092_s16 = smov 0  }
   0xb   :  { %s1094_s17 = smov 0   ;;  %s1096_s18 = smov 0  }
   0xc   :  { %s1098_s19 = smov 0   ;;  %s1100_s20 = smov 0  }
   0xd LB: > { %s663_s21 = sadd.s32 4294967295, %s1054_s20   ;;  %s664_s22 = sadd.s32 4294967294, %s1054_s20   ;;  %s1054_s20 = sphi %s1100_s20, %s24_s20   ;;  %s1050_s19 = sphi %s1098_s19, %s1454_s19   ;;  %s1046_s18 = sphi %s1096_s18, %s1453_s18   ;;  %s1042_s17 = sphi %s1094_s17, %s1452_s17   ;;  %s1038_s16 = sphi %s1092_s16, %s1451_s16   ;;  %s1034_s15 = sphi %s1090_s15, %s1450_s15  }
   0xe   : > { %p56_p0 = scmp.ne.s32.totalorder %s1038_s16, %s1034_s15  ;;  %p1124_p1 = scmp.eq.s32.totalorder %s663_s21, 0 }
   0xf   : > { %p1128_p2 = scmp.eq.s32.totalorder %s663_s21, 1  ;;  %p168_p3 = scmp.eq.s32.totalorder %s664_s22, 1 }
  0x10   : > { %s1431_s23 = scalar_select %p1124_p1, 1, 0 }
  0x11   : > { %p1134_p4 = por %p1124_p1, %p56_p0  ;;  %p665_p5 = scmp.ge.s32.totalorder %s1054_s20, 1 }
  0x12   : > { %p1139_p6 = por %p168_p3, %p56_p0  ;;  %p175_p7 = scmp.lt.s32.totalorder %s1054_s20, 3 }
  0x13   : > { %s1433_s25 = scalar_select %p1134_p4, 1, 0 }
  0x14   : > { %s1434_s26 = scalar_select %p1139_p6, 1, 0 }
  0x15   : > { %p1144_p8 = pnand %p665_p5, %p175_p7  ;;  %s1056_s28 = smov [#allocation5]  }
  0x16   : > { %s189_s29 = sshll.u32 %s1056_s28, 4  ;;  %s1057_s5 = smov [#allocation7]   ;;  %s1148_s29 = int_to_ptr.vmem [resolvable:$true] %s189_s29 }
  0x17   : > { %p765_p9 = pneg %p1144_p8  ;;  %s205_s6 = sshll.u32 %s1057_s5, 4  ;;  %s1159_s6 = int_to_ptr.vmem [resolvable:$true] %s205_s6 }
  0x18   : > { %s1437_s1 = sld [smem:[#allocation16_spill]] }
  0x19   : > { %p1155_p11 = pnand %p765_p9, %p1124_p1 }
  0x1b   : > { %p850_p13 = pneg %p1155_p11 }
  0x1e   : > { %s848_s9 = scalar_lea.hbm %s1437_s1, 128 }
  0x1f   : > { %p849_p12 = scmp.ne.s32.totalorder %s1437_s1, %s848_s9  ;;  %p855_p5 = scmp.lt.u32.totalorder %s848_s9, %s1437_s1 }
  0x21   : > { %p851_p0 = pnand %p850_p13, %p849_p12 }
  0x23   : > { %p852_p3 = pneg %p851_p0 }
  0x25   : > { %p857_p7 = pnand %p855_p5, %p852_p3 }
  0x27   : > { %860 = shalt.err (!%p857_p7)
}
  0x28   : > { %s861_s14 = scalar_lea.vmem %s1148_s29, 128  ;;  %p869_p1 = scmp.lt.s32.totalorder %s1148_s29, %s1148_s29 }
  0x29   : > { %p862_p9 = scmp.ne.s32.totalorder %s1148_s29, %s861_s14  ;;  %p870_p12 = scmp.lt.s32.totalorder %s861_s14, %s861_s14 }
  0x2b   : > { %p864_p10 = pnand %p862_p9, %p850_p13  ;;  %p871_p0 = por %p870_p12, %p869_p1 }
  0x2d   : > { %p865_p6 = pneg %p864_p10 }
  0x2f   : > { %p872_p4 = pnand %p871_p0, %p865_p6 }
  0x31   : > { %875 = shalt.err (!%p872_p4)
}
  0x32   : > { %s1058_s21 = smov 64   ;;  %s1059_s22 = smov 4  }
  0x33   : > { %768 = dma.hbm_to_vmem [thread:$0]  (!%p1155_p11), %s1437_s1, 128, %s1148_s29, [#allocation6], %s1058_s21, %s1058_s21, %s1059_s22  }
  0x34   : > { %s1438_s2 = sld [smem:[#allocation17_spill]] }
  0x3a   : > { %s876_s9 = scalar_lea.hbm %s1438_s2, 16 }
  0x3b   : > { %p877_p1 = scmp.ne.s32.totalorder %s1438_s2, %s876_s9  ;;  %p883_p10 = scmp.lt.u32.totalorder %s876_s9, %s1438_s2 }
  0x3d   : > { %p879_p4 = pnand %p877_p1, %p850_p13 }
  0x3f   : > { %p880_p6 = pneg %p879_p4 }
  0x41   : > { %p885_p3 = pnand %p883_p10, %p880_p6 }
  0x43   : > { %888 = shalt.err (!%p885_p3)
}
  0x44   : > { %s889_s29 = scalar_lea.vmem %s1159_s6, 16  ;;  %s896_s14 = scalar_lea.vmem %s1159_s6, 32 }
  0x45   : > { %p890_p5 = scmp.ne.s32.totalorder %s1159_s6, %s889_s29  ;;  %p897_p12 = scmp.lt.s32.totalorder %s1159_s6, %s1159_s6 }
  0x46   : > { %p898_p0 = scmp.lt.s32.totalorder %s896_s14, %s889_s29 }
  0x47   : > { %p892_p7 = pnand %p890_p5, %p850_p13 }
  0x48   : > { %p899_p1 = por %p898_p0, %p897_p12 }
  0x49   : > { %p893_p9 = pneg %p892_p7 }
  0x4b   : > { %p900_p4 = pnand %p899_p1, %p893_p9 }
  0x4d   : > { %903 = shalt.err (!%p900_p4)
}
  0x4e   : > { %771 = dma.hbm_to_vmem [thread:$0]  (!%p1155_p11), %s1438_s2, 16, %s1159_s6, [#allocation6]  }
  0x4f   : > { %s33_s7 = sadd.s32 1, %s1050_s19  ;;  %s43_s8 = sadd.s32 1, %s1042_s17 }
  0x50   : > { %p34_p13 = scmp.ge.s32.totalorder %s33_s7, 2  ;;  %p50_p6 = scmp.ne.s32.totalorder %s1042_s17, %s1038_s16 }
  0x51   : > { %p51_p10 = scmp.eq.s32.totalorder %s1054_s20, 0  ;;  %p785_p3 = scmp.lt.s32.totalorder %s1054_s20, 2 }
  0x52   : > { %s1456_s7 = smov (%p34_p13, %s33_s7), 0  ;;  %p1227_p7 = por %p1128_p2, %p50_p6 }
  0x53   : > { %p52_p5 = por %p51_p10, %p50_p6  ;;  %s40_s9 = ssub.s32 %s1050_s19, %s1456_s7 }
  0x54   : > { %s1439_s30 = scalar_select %p1227_p7, 1, 0 }
  0x55   : > { %s1234_s10 = sand.u32 1, %s1042_s17   ;;  %p41_p11 = scmp.eq.s32.totalorder %s40_s9, 0 }
  0x56   : > { %s1425_s6 = sshll.u32 %s1234_s10, 5  ;;  %s1426_s11 = sshll.u32 %s1050_s19, 9 }
  0x57   : > { %s1239_s12 = scalar_select %p41_p11, %s1042_s17, %s43_s8  }
  0x58   : > { %s1440_s0 = sld [smem:[#allocation15_spill]]  ;;  %s220_s14 = scalar_lea.vmem [#allocation2], %s1425_s6 }
  0x59   : > { %s227_s28 = sshll.u32 %s220_s14, 4  ;;  %p1252_p2 = pnand %p785_p3, %p52_p5  ;;  %s1256_s28 = int_to_ptr.vmem [resolvable:$true] %s227_s28 }
  0x5b   : > { %p906_p12 = pneg %p1252_p2 }
  0x5e   : > { %s1246_s24 = scalar_lea.hbm %s1440_s0, %s1426_s11  ;;  %s909_s14 = scalar_lea.hbm %s1440_s0, 1024 }
  0x5f   : > { %s904_s9 = scalar_lea.hbm %s1246_s24, 512  ;;  %p910_p4 = scmp.lt.u32.totalorder %s1246_s24, %s1440_s0 }
  0x60   : > { %p905_p9 = scmp.ne.s32.totalorder %s1246_s24, %s904_s9  ;;  %p911_p13 = scmp.lt.u32.totalorder %s909_s14, %s904_s9 }
  0x61   : > { %p913_p10 = scmp.lt.u32.totalorder %s904_s9, %s1246_s24 }
  0x62   : > { %p907_p0 = pnand %p906_p12, %p905_p9  ;;  %p912_p6 = por %p911_p13, %p910_p4 }
  0x64   : > { %p908_p1 = pneg %p907_p0  ;;  %p914_p3 = por %p913_p10, %p912_p6 }
  0x66   : > { %p915_p5 = pnand %p914_p3, %p908_p1 }
  0x68   : > { %918 = shalt.err (!%p915_p5)
}
  0x69   : > { %s919_s8 = scalar_lea.vmem %s1256_s28, 512  ;;  %s1060_s13 = smov [#allocation2]  }
  0x6a   : > { %p920_p11 = scmp.ne.s32.totalorder %s1256_s28, %s919_s8  ;;  %s924_s29 = sshll.u32 %s1060_s13, 4  ;;  %s925_s29 = int_to_ptr.vmem [resolvable:$false] %s924_s29 }
  0x6b   : > { %s926_s6 = scalar_lea.vmem %s925_s29, 1024  ;;  %p927_p7 = scmp.lt.s32.totalorder %s1256_s28, %s925_s29 }
  0x6c   : > { %p922_p9 = pnand %p920_p11, %p906_p12  ;;  %p928_p4 = scmp.lt.s32.totalorder %s926_s6, %s919_s8 }
  0x6e   : > { %p923_p0 = pneg %p922_p9  ;;  %p929_p13 = por %p928_p4, %p927_p7 }
  0x70   : > { %p930_p6 = pnand %p929_p13, %p923_p0 }
  0x72   : > { %933 = shalt.err (!%p930_p6)
}
  0x73   : > { %s1442_s11 = scalar_lea.sflag [#allocation3], %s1234_s10  ;;  %s1443_s9 = sshll.u32 %s1050_s19, 9 }
  0x74   : > { %775 = dma.hbm_to_vmem [thread:$0]  (!%p1252_p2), %s1246_s24, 512, %s1256_s28, %s1442_s11, %s1058_s21, %s1058_s21, %s1059_s22  }
  0x75   : > { %s1294_s13 = scalar_lea.hbm %s1420_s3, %s1443_s9  ;;  %s1444_s29 = sshll.u32 %s1234_s10, 5 }
  0x76   : > { %s241_s6 = scalar_lea.vmem [#allocation8], %s1444_s29  ;;  %s238_s1 = scalar_lea.sflag [#allocation9], %s1234_s10 }
  0x77   : > { %s249_s0 = sshll.u32 %s241_s6, 4  ;;  %s934_s2 = scalar_lea.hbm %s1294_s13, 512  ;;  %s1298_s0 = int_to_ptr.vmem [resolvable:$true] %s249_s0 }
  0x78   : > { %p935_p7 = scmp.ne.s32.totalorder %s1294_s13, %s934_s2  ;;  %s939_s11 = scalar_lea.hbm %s1420_s3, 1024 }
  0x79   : > { %p940_p3 = scmp.lt.u32.totalorder %s1294_s13, %s1420_s3  ;;  %p941_p5 = scmp.lt.u32.totalorder %s939_s11, %s934_s2 }
  0x7a   : > { %p937_p1 = pnand %p935_p7, %p906_p12  ;;  %p943_p9 = scmp.lt.u32.totalorder %s934_s2, %s1294_s13 }
  0x7b   : > { %p942_p11 = por %p941_p5, %p940_p3 }
  0x7c   : > { %p938_p10 = pneg %p937_p1 }
  0x7d   : > { %p944_p0 = por %p943_p9, %p942_p11 }
  0x7f   : > { %p945_p4 = pnand %p944_p0, %p938_p10 }
  0x81   : > { %948 = shalt.err (!%p945_p4)
}
  0x82   : > { %s949_s8 = scalar_lea.vmem %s1298_s0, 512  ;;  %s1061_s29 = smov [#allocation8]  }
  0x83   : > { %p950_p13 = scmp.ne.s32.totalorder %s1298_s0, %s949_s8  ;;  %s954_s6 = sshll.u32 %s1061_s29, 4  ;;  %s955_s6 = int_to_ptr.vmem [resolvable:$false] %s954_s6 }
  0x84   : > { %s956_s24 = scalar_lea.vmem %s955_s6, 1024  ;;  %p957_p1 = scmp.lt.s32.totalorder %s1298_s0, %s955_s6 }
  0x85   : > { %p952_p6 = pnand %p950_p13, %p906_p12  ;;  %p958_p3 = scmp.lt.s32.totalorder %s956_s24, %s949_s8 }
  0x87   : > { %p953_p7 = pneg %p952_p6  ;;  %p959_p5 = por %p958_p3, %p957_p1 }
  0x89   : > { %p960_p11 = pnand %p959_p5, %p953_p7 }
  0x8b   : > { %963 = shalt.err (!%p960_p11)
}
  0x8c   : > { %778 = dma.hbm_to_vmem [thread:$0]  (!%p1252_p2), %s1294_s13, 512, %s1298_s0, %s238_s1, %s1058_s21, %s1058_s21, %s1059_s22  }
  0x8d   : > { %261 = sbr.rel (%p1144_p8) target bundleno = 397 (0x18d), region = 36  ;;  %s1332_s2 = sand.u32 (!%p1144_p8), 1, %s1038_s16  }
  0x8e   : > { %s1335_s28 = sshll.u32 (!%p1144_p8), %s1332_s2, 5  ;;  %s264_s5 = scalar_lea.sflag (!%p1144_p8), [#allocation3], %s1332_s2 }
  0x8f   : > { %s267_s11 = scalar_lea.vmem (!%p1144_p8), [#allocation2], %s1335_s28  ;;  %p1445_p12 = scmp.ne.s32.totalorder (!%p1144_p8), %s1433_s25, 0 }
  0x94   : > { %1017 = dma.done.wait (%p1445_p12), %s264_s5, 512  }
  0x95   : > { %1019 = vsyncadd (%p1445_p12), %s264_s5, 4294966784  ;;  %p1446_p2 = scmp.ne.s32.totalorder %s1431_s23, 0 }
  0x97   : > { %1021 = dma.done.wait (%p1446_p2), [#allocation6], 144  }
  0x98   : > { %1023 = vsyncadd (%p1446_p2), [#allocation6], 4294967152  ;;  %s281_s0 = scalar_lea.sflag [#allocation9], %s1332_s2  ;;  %s284_s1 = scalar_lea.vmem [#allocation8], %s1335_s28 }
  0x99   : > { %1025 = dma.done.wait (%p1445_p12), %s281_s0, 512  }
  0x9a   : > { %1027 = vsyncadd (%p1445_p12), %s281_s0, 4294966784  ;;  %v843_v0 = vld [vmem:[#allocation5] sm:$0xff]   ;;  %vm352_vm0 = vcmask 130048   ;;  %v845_v2 = vld [vmem:[%s267_s11 + $0x10] sm:$0xff]   ;;  %vm508_vm1 = vcmask 519168   ;;  %s714_s23 = sshll.u32 %s1046_s18, 9 }
  0x9b   : > { %v844_v1 = vld [vmem:[%s267_s11] sm:$0xff]   ;;  %739 = vmatprep.subr.bf16.mxu0 %v843_v0  ;;  %749 = vmatprep.subr.bf16.mxu1 %v843_v0  ;;  %v846_v3 = vld [vmem:[%s267_s11 + $0x8] sm:$0xff]   ;;  %v847_v4 = vld [vmem:[%s267_s11 + $0x18] sm:$0xff]   ;;  %s313_s25 = scalar_lea.vmem [#allocation10], %s1335_s28  ;;  %s1360_s22 = scalar_lea.hbm %s1421_s4, %s714_s23 }
  0x9c   : > { %740 = vmatpush3.bf16.msra.mxu0 %v843_v0  ;;  %750 = vmatpush3.bf16.msra.mxu1 %v843_v0  ;;  %v731_v5 = vld [vmem:[%s284_s1 + $0x8] sm:$0xff]   ;;  %v733_v6 = vld [vmem:[%s284_s1 + $0x18] sm:$0xff]   ;;  %v716_v7 = vld [vmem:[%s284_s1] sm:$0xff]   ;;  %s532_s27 = sshll.u32 %s313_s25, 4  ;;  %s518_s10 = scalar_lea.sflag [#allocation4], %s1332_s2  ;;  %s1362_s27 = int_to_ptr.vmem [resolvable:$true] %s532_s27 }
  0x9d   : > { %741 = vmatprep.mubr.msk.bf16.mxu0 %vm352_vm0, %v844_v1  ;;  %745 = vmatprep.mubr.msk.bf16.mxu1 %vm352_vm0, %v845_v2  ;;  %v732_v8 = vld [vmem:[%s284_s1 + $0x10] sm:$0xff]   ;;  %v690_v9 = vld [vmem:[#allocation7] ss:$0 sm:$0xff]  ;;  %v721_v10 = vunpack.c.l.bf16 %v731_v5  ;;  %v729_v11 = vunpack.c.l.bf16 %v733_v6  ;;  %v717_v14 = vunpack.c.l.bf16 %v716_v7  ;;  %v722_v16 = vunpack.c.h.bf16 %v731_v5  ;;  %s964_s13 = scalar_lea.vmem %s1362_s27, 512  ;;  %p1447_p10 = scmp.ne.s32.totalorder %s1439_s30, 0 }
  0x9e   : > { %v725_v15 = vunpack.c.l.bf16 %v732_v8  ;;  %v730_v21 = vunpack.c.h.bf16 %v733_v6  ;;  %v718_v22 = vunpack.c.h.bf16 %v716_v7  ;;  %v726_v27 = vunpack.c.h.bf16 %v732_v8  ;;  %p965_p8 = scmp.ne.s32.totalorder %s1362_s27, %s964_s13  ;;  %s1062_s9 = smov [#allocation10]  }
  0x9f   : > { %742 = vmatmul.mubr.msk.bf16.vlgmr.msra.gmra.mrb[0].mxu0 %vm352_vm0, %v846_v3  ;;  %746 = vmatmul.mubr.msk.bf16.vlgmr.msra.gmra.mrb[0].mxu1 %vm352_vm0, %v847_v4  ;;  %s968_s14 = sshll.u32 %s1062_s9, 4  ;;  %s969_s14 = int_to_ptr.vmem [resolvable:$false] %s968_s14 }
  0xa0   : > { %p966_p9 = pnand %p965_p8, %p1447_p10  ;;  %s970_s8 = scalar_lea.vmem %s969_s14, 1024 }
  0xa1   : > { %p971_p4 = scmp.lt.s32.totalorder %s1362_s27, %s969_s14  ;;  %p972_p13 = scmp.lt.s32.totalorder %s970_s8, %s964_s13 }
  0xa2   : > { %p967_p0 = pneg %p966_p9 }
  0xa3   : > { %p973_p6 = por %p972_p13, %p971_p4 }
  0xa5   : > { %p974_p7 = pnand %p973_p6, %p967_p0 }
 0x172   : > { %v743_v12 = vpop.f32.mrb[0].mxu0  ;;  %v747_v13 = vpop.f32.mrb[0].mxu1 }
 0x173   : > { %v438_v17 = vadd.f32 %v743_v12, %v690_v9  ;;  %v442_v18 = vadd.f32 %v747_v13, %v690_v9  ;;  %v399_v19 = vpop.f32.mrb[1].mxu0  ;;  %v415_v20 = vpop.f32.mrb[1].mxu1 }
 0x174   : > { %v436_v23 = vadd.f32 %v690_v9, %v399_v19  ;;  %v440_v24 = vadd.f32 %v690_v9, %v415_v20  ;;  %v744_v25 = vpop.f32.mrb[2].mxu0  ;;  %v748_v26 = vpop.f32.mrb[2].mxu1 }
 0x175   : > { %v462_v28 = vadd.f32 %v721_v10, %v438_v17  ;;  %v466_v29 = vadd.f32 %v729_v11, %v442_v18  ;;  %v439_v30 = vadd.f32 %v744_v25, %v690_v9  ;;  %v443_v31 = vadd.f32 %v748_v26, %v690_v9  ;;  %v402_v32 = vpop.f32.mrb[3].mxu0  ;;  %v418_v33 = vpop.f32.mrb[3].mxu1 }
 0x176   : > { %v460_v34 = vadd.f32 %v717_v14, %v436_v23  ;;  %v464_v35 = vadd.f32 %v725_v15, %v440_v24  ;;  %v437_v36 = vadd.f32 %v690_v9, %v402_v32  ;;  %v441_v37 = vadd.f32 %v690_v9, %v418_v33 }
 0x177   : > { %v470_v38 = vmax.f32 %v462_v28, 0.0  ;;  %v474_v39 = vmax.f32 %v466_v29, 0.0  ;;  %v463_v40 = vadd.f32 %v722_v16, %v439_v30  ;;  %v467_v41 = vadd.f32 %v730_v21, %v443_v31 }
 0x178   : > { %v468_v42 = vmax.f32 %v460_v34, 0.0  ;;  %v472_v43 = vmax.f32 %v464_v35, 0.0  ;;  %v461_v44 = vadd.f32 %v718_v22, %v437_v36  ;;  %v465_v45 = vadd.f32 %v726_v27, %v441_v37 }
 0x179   : > { %v708_v46 = vpack.c.bf16 %v470_v38, %v470_v38  ;;  %v712_v47 = vpack.c.bf16 %v474_v39, %v474_v39  ;;  %v471_v48 = vmax.f32 %v463_v40, 0.0  ;;  %v475_v49 = vmax.f32 %v467_v41, 0.0 }
 0x17a   : > { %v706_v50 = vpack.c.bf16 %v468_v42, %v468_v42  ;;  %v710_v51 = vpack.c.bf16 %v472_v43, %v472_v43  ;;  %v469_v52 = vmax.f32 %v461_v44, 0.0  ;;  %v473_v53 = vmax.f32 %v465_v45, 0.0 }
 0x17b   : > { %511 = vst.msk [vmem:[%s313_s25 + $0x8] sm:$0xf] %vm508_vm1, %v708_v46  ;;  %515 = vst.msk [vmem:[%s313_s25 + $0x18] sm:$0xf] %vm508_vm1, %v712_v47  ;;  %v709_v54 = vpack.c.bf16 %v471_v48, %v471_v48  ;;  %v713_v55 = vpack.c.bf16 %v475_v49, %v475_v49 }
 0x17c   : > { %509 = vst.msk [vmem:[%s313_s25] sm:$0xf] %vm508_vm1, %v706_v50  ;;  %513 = vst.msk [vmem:[%s313_s25 + $0x10] sm:$0xf] %vm508_vm1, %v710_v51  ;;  %v707_v56 = vpack.c.bf16 %v469_v52, %v469_v52  ;;  %v711_v57 = vpack.c.bf16 %v473_v53, %v473_v53 }
 0x17d   : > { %512 = vst.msk [vmem:[%s313_s25 + $0xc] sm:$0xf] %vm508_vm1, %v709_v54  ;;  %516 = vst.msk [vmem:[%s313_s25 + $0x1c] sm:$0xf] %vm508_vm1, %v713_v55 }
 0x17e   : > { %510 = vst.msk [vmem:[%s313_s25 + $0x4] sm:$0xf] %vm508_vm1, %v707_v56  ;;  %514 = vst.msk [vmem:[%s313_s25 + $0x14] sm:$0xf] %vm508_vm1, %v711_v57 }
 0x17f   : > { %977 = shalt.err (!%p974_p7)
}
 0x180   : > { %s978_s29 = scalar_lea.hbm %s1360_s22, 512  ;;  %s982_s28 = scalar_lea.hbm %s1421_s4, 1024 }
 0x181   : > { %p979_p1 = scmp.ne.s32.totalorder %s1360_s22, %s978_s29  ;;  %p983_p11 = scmp.lt.u32.totalorder %s1360_s22, %s1421_s4 }
 0x182   : > { %p984_p12 = scmp.lt.u32.totalorder %s982_s28, %s978_s29  ;;  %p986_p8 = scmp.lt.u32.totalorder %s978_s29, %s1360_s22 }
 0x183   : > { %p980_p3 = pnand %p979_p1, %p1447_p10 }
 0x184   : > { %p985_p2 = por %p984_p12, %p983_p11 }
 0x185   : > { %p981_p5 = pneg %p980_p3 }
 0x186   : > { %p987_p9 = por %p986_p8, %p985_p2 }
 0x188   : > { %p988_p0 = pnand %p987_p9, %p981_p5 }
 0x18a   : > { %991 = shalt.err (!%p988_p0)
}
 0x18b   : > { %s1063_s0 = smov 64   ;;  %s1064_s1 = smov 4  }
 0x18c   : > { %763 = dma.vmem_to_hbm [thread:$0]  (%p1447_p10), %s1362_s27, 512, %s1360_s22, %s518_s10, %s1063_s0, %s1063_s0, %s1064_s1  }
 0x18d PF: > { %s547_s23 = sand.u32 1, %s1034_s15   ;;  %p1448_p4 = scmp.ne.s32.totalorder %s1434_s26, 0 }
 0x18e   : > { %p1449_p13 = scmp.ge.s32.totalorder %s1054_s20, 2  ;;  %s548_s25 = scalar_lea.sflag [#allocation4], %s547_s23 }
 0x190   : > { %p780_p6 = pnand %p1449_p13, %p1448_p4 }
 0x192   : > { %1029 = dma.done.wait (!%p780_p6), %s548_s25, 512  }
 0x193   : > { %1031 = vsyncadd (!%p780_p6), %s548_s25, 4294966784  ;;  %s24_s20 = sadd.s32 1, %s1054_s20   ;;  %s1450_s15 = smov %s1038_s16 }
 0x194   : > { %p21_p7 = scmp.ge.s32.totalorder %s24_s20, 4   ;;  %s1451_s16 = smov %s1042_s17 }
 0x195   : > { %s1452_s17 = smov %s1239_s12  ;;  %s1453_s18 = smov %s1050_s19 }
 0x196   : > { %s1454_s19 = smov %s1456_s7  ;;  %23 = sbr.rel (!%p21_p7) target bundleno = 13 (0xd), region = 104 }
 0x19d   :  { %553 = vsyncpa [#allocation3], 1 }
 0x19e   :  { %555 = vsyncpa [#allocation3 + $0x1], 1 }
 0x19f   :  { %556 = vsyncpa [#allocation6], 1 }
 0x1a0   :  { %557 = vsyncpa [#allocation9], 1 }
 0x1a1   :  { %559 = vsyncpa [#allocation9 + $0x1], 1 }
 0x1a2   :  { %560 = vsyncpa [#allocation4], 1 }
 0x1a3   :  { %562 = vsyncpa [#allocation4 + $0x1], 1 }

</bundles_post_ra>
